<compile_context>
chip_gen: v6e
topology: v6e:2x2x1
jax: 0.10.0
libtpu: 0.0.40
codegen_flags: <defaults>
</compile_context>

<pallas_src>
import jax
import jax.numpy as jnp
from jax import lax
from jax.experimental import pallas as pl
from jax.experimental.pallas import tpu as pltpu

# ----------------------------- config (small, self-consistent) -----------------------------
B = 2            # batch
S = 8            # sequence length
H = 32           # config.Model.embedding_size
NH = 2           # attention heads
HD = H // NH     # head dim
FF = 4 * H       # FFN intermediate
L = 2            # encoder layers
C = 7            # len(EMOTION_LABELS)  (config.DownStream.output_size)
HID = H // 4     # BaseClassifier hidden size = embedding_size / 4
VOCAB = 50
PAD_IDX = 1
MAXPOS = S + PAD_IDX + 2
EMB_N = VOCAB + MAXPOS + 1     # fused [word | position | token-type] table rows
LN_EPS = 1e-5
BS = B * S

EMOTION_LABELS = ['anger', 'disgust', 'fear', 'joy', 'neutral', 'sadness', 'surprise']
CLASS_TO_IDX = {name: i for i, name in enumerate(EMOTION_LABELS)}

_VMEM = pltpu.MemorySpace.VMEM


# ----------------------------- in-kernel helpers -----------------------------
def _layernorm(x, g, b):
    mu = jnp.mean(x, axis=-1, keepdims=True)
    xc = x - mu
    var = jnp.mean(xc * xc, axis=-1, keepdims=True)
    return xc * jax.lax.rsqrt(var + LN_EPS) * g + b


def _gelu(x):
    # TODO(synk): RoBERTa/PyTorch use exact erf GELU; tanh approximation used for safe lowering.
    return 0.5 * x * (1.0 + jnp.tanh(0.7978845608028654 * (x + 0.044715 * x * x * x)))


# ----------------------------- fused Pallas kernel -----------------------------
def fused_roberta_kernel(ids_ref, pids_ref, lbl_ref, mask_ref,
                         tbl_ref, embg_ref, embb_ref,
                         wqkv_ref, bqkv_ref, wo_ref, bo_ref, ln1g_ref, ln1b_ref,
                         wi_ref, bi_ref, wo2_ref, bo2_ref, ln2g_ref, ln2b_ref,
                         cw1_ref, cb1_ref, cw2_ref, cb2_ref,
                         pred_ref, loss_ref):
    f32 = jnp.float32
    bf16 = jnp.bfloat16

    # ---- fused embedding "gather": {0,1} selection matrix @ [word|pos|tok] table (idle MXU) ----
    col = jax.lax.broadcasted_iota(jnp.int32, (BS, EMB_N), 1)
    sel = ((col == ids_ref[...]).astype(f32)
           + (col == pids_ref[...] + VOCAB).astype(f32)
           + (col == EMB_N - 1).astype(f32))                        # token-type-0 row
    emb = jnp.dot(sel, tbl_ref[...], preferred_element_type=f32)    # [BS, H]
    x = _layernorm(emb, embg_ref[...], embb_ref[...])

    # additive attention mask (batch-block + key padding), hoisted out of the layer loop
    addmask = mask_ref[...]                                         # [BS, BS]

    # ---- encoder layers (unrolled, all weights resident in VMEM) ----
    for l in range(L):
        # one fused QKV matmul; column blocks: [q | k_h0 | k_h1 | v_h0 | v_h1] (head-masked,
        # attention scale pre-folded into the q block host-side)
        qkv = jnp.dot(x.astype(bf16), wqkv_ref[l],
                      preferred_element_type=f32) + bqkv_ref[l]     # [BS, (1+2*NH)*H]
        q = qkv[:, 0:H].astype(bf16)

        ctx = None
        for h in range(NH):
            kw = qkv[:, (1 + h) * H:(2 + h) * H].astype(bf16)            # zeros off-head
            vw = qkv[:, (1 + NH + h) * H:(2 + NH + h) * H].astype(bf16)  # zeros off-head
            # scores for head h: off-head q columns hit zeroed kw columns -> no contribution
            s = lax.dot_general(q, kw, (((1,), (1,)), ((), ())),
                                preferred_element_type=f32) + addmask    # [BS, BS]
            m = jnp.max(s, axis=-1, keepdims=True)
            e = jnp.exp(s - m)
            p = e * pl.reciprocal(jnp.sum(e, axis=-1, keepdims=True), approx=True)
            part = jnp.dot(p.astype(bf16), vw, preferred_element_type=f32)  # ctx in head-h cols
            ctx = part if ctx is None else ctx + part                       # head-concat layout

        attn = jnp.dot(ctx.astype(bf16), wo_ref[l],
                       preferred_element_type=f32) + bo_ref[l]
        h1 = _layernorm(x + attn, ln1g_ref[l], ln1b_ref[l])
        ff = _gelu(jnp.dot(h1.astype(bf16), wi_ref[l],
                           preferred_element_type=f32) + bi_ref[l])
        ff = jnp.dot(ff.astype(bf16), wo2_ref[l],
                     preferred_element_type=f32) + bo2_ref[l]
        x = _layernorm(h1 + ff, ln2g_ref[l], ln2b_ref[l])

    # ---- CLS rows -> BaseClassifier (Linear -> ReLU -> Linear -> Sigmoid) ----
    cls = x.reshape(B, S, H)[:, 0, :]                               # [B, H], one strided slice
    hcls = jnp.maximum(
        jnp.dot(cls.astype(bf16), cw1_ref[...], preferred_element_type=f32) + cb1_ref[...], 0.0)
    logits = jnp.dot(hcls.astype(bf16), cw2_ref[...],
                     preferred_element_type=f32) + cb2_ref[...]
    prob = jax.nn.sigmoid(logits)                                   # BaseClassifier ends in Sigmoid
    pred_ref[...] = prob

    # ---- F.one_hot(labels) + nn.BCELoss(reduction='mean'), fused in-kernel ----
    ccol = jax.lax.broadcasted_iota(jnp.int32, (B, C), 1)
    tgt = (ccol == lbl_ref[...]).astype(f32)
    eps = 1e-12   # TODO(synk): PyTorch BCELoss clamps log at -100 instead of adding eps.
    bce = -(tgt * jnp.log(prob + eps) + (1.0 - tgt) * jnp.log(1.0 - prob + eps))
    loss_ref[...] = jnp.mean(bce) * jnp.ones((1, 1), f32)


# ----------------------------- parameters & packing -----------------------------
def init_params(key):
    std = 0.02
    keys = iter(jax.random.split(key, 64))

    def nrm(shape):
        return (std * jax.random.normal(next(keys), shape)).astype(jnp.float32)

    layers = []
    for _ in range(L):
        layers.append({
            'wq': nrm((H, H)), 'bq': jnp.zeros((1, H), jnp.float32),
            'wk': nrm((H, H)), 'bk': jnp.zeros((1, H), jnp.float32),
            'wv': nrm((H, H)), 'bv': jnp.zeros((1, H), jnp.float32),
            'wo': nrm((H, H)), 'bo': jnp.zeros((1, H), jnp.float32),
            'ln1g': jnp.ones((1, H), jnp.float32), 'ln1b': jnp.zeros((1, H), jnp.float32),
            'wi': nrm((H, FF)), 'bi': jnp.zeros((1, FF), jnp.float32),
            'wo2': nrm((FF, H)), 'bo2': jnp.zeros((1, H), jnp.float32),
            'ln2g': jnp.ones((1, H), jnp.float32), 'ln2b': jnp.zeros((1, H), jnp.float32),
        })

    word_emb = nrm((VOCAB, H))
    pos_emb = nrm((MAXPOS, H))
    tok_emb = nrm((1, H))

    p = {
        # fused embedding table: [word | position | token-type] rows (f32 -> exact "gather")
        'emb_tbl': jnp.concatenate([word_emb, pos_emb, tok_emb], axis=0),   # [EMB_N, H]
        'emb_ln_g': jnp.ones((1, H), jnp.float32),
        'emb_ln_b': jnp.zeros((1, H), jnp.float32),
        'cls_w1': nrm((H, HID)).astype(jnp.bfloat16),
        'cls_b1': jnp.zeros((1, HID), jnp.float32),
        'cls_w2': nrm((HID, C)).astype(jnp.bfloat16),
        'cls_b2': jnp.zeros((1, C), jnp.float32),
    }

    # QKV packing: [Wq*scale | Wk(head0-masked) | Wk(head1-masked) | Wv(head0) | Wv(head1)]
    # so each head's score / context matmul reads a plain column block of the fused QKV output
    # (no per-head slice+concat / reshape in the kernel). Scale = 1/sqrt(HD) folded into Wq/bq.
    scale = 1.0 / (HD ** 0.5)

    def head_mask(h):
        return jnp.zeros((1, H), jnp.float32).at[:, h * HD:(h + 1) * HD].set(1.0)

    def pack(lp, q_key, k_key, v_key):
        blocks = [lp[q_key] * scale]
        blocks += [lp[k_key] * head_mask(h) for h in range(NH)]
        blocks += [lp[v_key] * head_mask(h) for h in range(NH)]
        return jnp.concatenate(blocks, axis=1)                      # [., (1+2*NH)*H]

    p['wqkv'] = jnp.stack([pack(lp, 'wq', 'wk', 'wv') for lp in layers]).astype(jnp.bfloat16)
    p['bqkv'] = jnp.stack([pack(lp, 'bq', 'bk', 'bv') for lp in layers])     # f32
    for name in ('wo', 'wi', 'wo2'):
        p[name] = jnp.stack([lp[name] for lp in layers]).astype(jnp.bfloat16)
    for name in ('bo', 'ln1g', 'ln1b', 'bi', 'bo2', 'ln2g', 'ln2b'):
        p[name] = jnp.stack([lp[name] for lp in layers])
    return p


# ----------------------------- wrapper -----------------------------
def naive_roberta_forward(input_ids, attn_mask, labels, params):
    # RoBERTa-style position ids: cumsum over the attention mask, offset by padding_idx.
    pos_ids = (jnp.cumsum(attn_mask, axis=1) * attn_mask).astype(jnp.int32) + PAD_IDX

    ids = input_ids.reshape(BS, 1).astype(jnp.int32)
    pids = pos_ids.reshape(BS, 1).astype(jnp.int32)
    lbls = labels.reshape(B, 1).astype(jnp.int32)

    # additive attention mask over flattened (b*S+s) rows/cols:
    # 0 where query & key share a batch and the key is not padding, -1e9 otherwise.
    bidx = jnp.arange(BS) // S
    same_batch = bidx[:, None] == bidx[None, :]
    key_ok = attn_mask.reshape(BS) > 0.5
    addmask = jnp.where(same_batch & key_ok[None, :], 0.0, -1e9).astype(jnp.float32)

    args = (ids, pids, lbls, addmask,
            params['emb_tbl'], params['emb_ln_g'], params['emb_ln_b'],
            params['wqkv'], params['bqkv'], params['wo'], params['bo'],
            params['ln1g'], params['ln1b'],
            params['wi'], params['bi'], params['wo2'], params['bo2'],
            params['ln2g'], params['ln2b'],
            params['cls_w1'], params['cls_b1'], params['cls_w2'], params['cls_b2'])

    pred, loss = pl.pallas_call(
        fused_roberta_kernel,
        out_shape=(jax.ShapeDtypeStruct((B, C), jnp.float32),
                   jax.ShapeDtypeStruct((1, 1), jnp.float32)),
        in_specs=[pl.BlockSpec(memory_space=_VMEM)] * len(args),
        out_specs=(pl.BlockSpec(memory_space=_VMEM),
                   pl.BlockSpec(memory_space=_VMEM)),
    )(*args)
    return loss[0, 0], pred


# ----------------------------- main -----------------------------
if __name__ == "__main__":
    key = jax.random.PRNGKey(0)
    pkey, dkey = jax.random.split(key)
    params = init_params(pkey)

    # synthetic "tokenized" batch (tokenizer not available): id 0 = <s>/CLS, 1 = <pad>
    input_ids = jax.random.randint(dkey, (B, S), 2, VOCAB).astype(jnp.int32)
    input_ids = input_ids.at[:, 0].set(0)
    attn_mask = jnp.ones((B, S), jnp.float32)
    attn_mask = attn_mask.at[1, 6:].set(0.0)               # second sample is padded
    input_ids = jnp.where(attn_mask > 0, input_ids, PAD_IDX).astype(jnp.int32)

    # samples['emotion'] = ['joy', 'sadness']
    labels = jnp.array([CLASS_TO_IDX['joy'], CLASS_TO_IDX['sadness']], jnp.int32)

    loss, pred = jax.jit(naive_roberta_forward)(input_ids, attn_mask, labels, params)
    jax.block_until_ready((loss, pred))
    assert pred.shape == (B, C) and loss.shape == ()
    print("KERNEL_OK")
</pallas_src>

<mosaic_0001>
module attributes {stable_mosaic.version = 11 : i64} {
  func.func @fused_roberta_kernel(%arg0: memref<16x1xi32, #tpu.memory_space<vmem>>, %arg1: memref<16x1xi32, #tpu.memory_space<vmem>>, %arg2: memref<2x1xi32, #tpu.memory_space<vmem>>, %arg3: memref<16x16xf32, #tpu.memory_space<vmem>>, %arg4: memref<62x32xf32, #tpu.memory_space<vmem>>, %arg5: memref<1x32xf32, #tpu.memory_space<vmem>>, %arg6: memref<1x32xf32, #tpu.memory_space<vmem>>, %arg7: memref<2x32x160xbf16, #tpu.memory_space<vmem>>, %arg8: memref<2x1x160xf32, #tpu.memory_space<vmem>>, %arg9: memref<2x32x32xbf16, #tpu.memory_space<vmem>>, %arg10: memref<2x1x32xf32, #tpu.memory_space<vmem>>, %arg11: memref<2x1x32xf32, #tpu.memory_space<vmem>>, %arg12: memref<2x1x32xf32, #tpu.memory_space<vmem>>, %arg13: memref<2x32x128xbf16, #tpu.memory_space<vmem>>, %arg14: memref<2x1x128xf32, #tpu.memory_space<vmem>>, %arg15: memref<2x128x32xbf16, #tpu.memory_space<vmem>>, %arg16: memref<2x1x32xf32, #tpu.memory_space<vmem>>, %arg17: memref<2x1x32xf32, #tpu.memory_space<vmem>>, %arg18: memref<2x1x32xf32, #tpu.memory_space<vmem>>, %arg19: memref<32x8xbf16, #tpu.memory_space<vmem>>, %arg20: memref<1x8xf32, #tpu.memory_space<vmem>>, %arg21: memref<8x7xbf16, #tpu.memory_space<vmem>>, %arg22: memref<1x7xf32, #tpu.memory_space<vmem>>, %arg23: memref<2x7xf32, #tpu.memory_space<vmem>>, %arg24: memref<1x1xf32, #tpu.memory_space<vmem>>) attributes {dimension_semantics = [], scalar_prefetch = 0 : i64, scratch_operands = 0 : i64, tpu.core_type = #tpu.core_type<tc>} {
    %0 = tpu.iota {dimensions = array<i32: 1>} : vector<16x62xi32>
    %c0 = arith.constant 0 : index
    %c0_0 = arith.constant 0 : index
    %1 = vector.load %arg0[%c0, %c0_0] : memref<16x1xi32, #tpu.memory_space<vmem>>, vector<16x1xi32>
    %2 = vector.broadcast %1 : vector<16x1xi32> to vector<16x62xi32>
    %3 = arith.cmpi eq, %0, %2 : vector<16x62xi32>
    %4 = arith.extui %3 : vector<16x62xi1> to vector<16x62xi32>
    %5 = arith.sitofp %4 : vector<16x62xi32> to vector<16x62xf32>
    %c0_1 = arith.constant 0 : index
    %c0_2 = arith.constant 0 : index
    %6 = vector.load %arg1[%c0_1, %c0_2] : memref<16x1xi32, #tpu.memory_space<vmem>>, vector<16x1xi32>
    %c50_i32 = arith.constant 50 : i32
    %7 = vector.broadcast %c50_i32 : i32 to vector<16x1xi32>
    %8 = arith.addi %6, %7 : vector<16x1xi32>
    %9 = vector.broadcast %8 : vector<16x1xi32> to vector<16x62xi32>
    %10 = arith.cmpi eq, %0, %9 : vector<16x62xi32>
    %11 = arith.extui %10 : vector<16x62xi1> to vector<16x62xi32>
    %12 = arith.sitofp %11 : vector<16x62xi32> to vector<16x62xf32>
    %13 = arith.addf %5, %12 : vector<16x62xf32>
    %c61_i32 = arith.constant 61 : i32
    %14 = vector.broadcast %c61_i32 : i32 to vector<16x62xi32>
    %15 = arith.cmpi eq, %0, %14 : vector<16x62xi32>
    %16 = arith.extui %15 : vector<16x62xi1> to vector<16x62xi32>
    %17 = arith.sitofp %16 : vector<16x62xi32> to vector<16x62xf32>
    %18 = arith.addf %13, %17 : vector<16x62xf32>
    %c0_3 = arith.constant 0 : index
    %c0_4 = arith.constant 0 : index
    %19 = vector.load %arg4[%c0_3, %c0_4] : memref<62x32xf32, #tpu.memory_space<vmem>>, vector<62x32xf32>
    %cst = arith.constant dense<0.000000e+00> : vector<16x32xf32>
    %20 = tpu.matmul %18, %19, %cst {dimension_numbers = #tpu.dot_dimension_numbers<[1], [0], [0], [1], [0, 0, 1, 1], [], []>} : vector<16x62xf32>, vector<62x32xf32>, vector<16x32xf32> -> vector<16x32xf32>
    %c0_5 = arith.constant 0 : index
    %c0_6 = arith.constant 0 : index
    %21 = vector.load %arg5[%c0_5, %c0_6] : memref<1x32xf32, #tpu.memory_space<vmem>>, vector<1x32xf32>
    %c0_7 = arith.constant 0 : index
    %c0_8 = arith.constant 0 : index
    %22 = vector.load %arg6[%c0_7, %c0_8] : memref<1x32xf32, #tpu.memory_space<vmem>>, vector<1x32xf32>
    %cst_9 = arith.constant dense<0.000000e+00> : vector<16xf32>
    %23 = vector.multi_reduction <add>, %20, %cst_9 [1] : vector<16x32xf32> to vector<16xf32>
    %24 = vector.shape_cast %23 : vector<16xf32> to vector<16x1xf32>
    %cst_10 = arith.constant 3.200000e+01 : f32
    %25 = vector.broadcast %cst_10 : f32 to vector<16x1xf32>
    %26 = arith.divf %24, %25 : vector<16x1xf32>
    %27 = vector.broadcast %26 : vector<16x1xf32> to vector<16x32xf32>
    %28 = arith.subf %20, %27 : vector<16x32xf32>
    %29 = arith.mulf %28, %28 : vector<16x32xf32>
    %cst_11 = arith.constant dense<0.000000e+00> : vector<16xf32>
    %30 = vector.multi_reduction <add>, %29, %cst_11 [1] : vector<16x32xf32> to vector<16xf32>
    %31 = vector.shape_cast %30 : vector<16xf32> to vector<16x1xf32>
    %cst_12 = arith.constant 3.200000e+01 : f32
    %32 = vector.broadcast %cst_12 : f32 to vector<16x1xf32>
    %33 = arith.divf %31, %32 : vector<16x1xf32>
    %cst_13 = arith.constant 9.99999974E-6 : f32
    %34 = vector.broadcast %cst_13 : f32 to vector<16x1xf32>
    %35 = arith.addf %33, %34 : vector<16x1xf32>
    %36 = math.rsqrt %35 : vector<16x1xf32>
    %37 = vector.broadcast %36 : vector<16x1xf32> to vector<16x32xf32>
    %38 = arith.mulf %28, %37 : vector<16x32xf32>
    %39 = vector.broadcast %21 : vector<1x32xf32> to vector<16x32xf32>
    %40 = arith.mulf %38, %39 : vector<16x32xf32>
    %41 = vector.broadcast %22 : vector<1x32xf32> to vector<16x32xf32>
    %42 = arith.addf %40, %41 : vector<16x32xf32>
    %c0_14 = arith.constant 0 : index
    %c0_15 = arith.constant 0 : index
    %43 = vector.load %arg3[%c0_14, %c0_15] : memref<16x16xf32, #tpu.memory_space<vmem>>, vector<16x16xf32>
    %44 = arith.truncf %42 : vector<16x32xf32> to vector<16x32xbf16>
    %c0_16 = arith.constant 0 : index
    %c0_17 = arith.constant 0 : index
    %c0_18 = arith.constant 0 : index
    %45 = vector.load %arg7[%c0_16, %c0_17, %c0_18] : memref<2x32x160xbf16, #tpu.memory_space<vmem>>, vector<1x32x160xbf16>
    %46 = vector.shape_cast %45 : vector<1x32x160xbf16> to vector<32x160xbf16>
    %cst_19 = arith.constant dense<0.000000e+00> : vector<16x160xf32>
    %47 = tpu.matmul %44, %46, %cst_19 {dimension_numbers = #tpu.dot_dimension_numbers<[1], [0], [0], [1], [0, 0, 1, 1], [], []>} : vector<16x32xbf16>, vector<32x160xbf16>, vector<16x160xf32> -> vector<16x160xf32>
    %c0_20 = arith.constant 0 : index
    %c0_21 = arith.constant 0 : index
    %c0_22 = arith.constant 0 : index
    %48 = vector.load %arg8[%c0_20, %c0_21, %c0_22] : memref<2x1x160xf32, #tpu.memory_space<vmem>>, vector<1x1x160xf32>
    %49 = vector.shape_cast %48 : vector<1x1x160xf32> to vector<1x160xf32>
    %50 = vector.broadcast %49 : vector<1x160xf32> to vector<16x160xf32>
    %51 = arith.addf %47, %50 : vector<16x160xf32>
    %52 = vector.extract_strided_slice %51 {offsets = [0, 0], sizes = [16, 32], strides = [1, 1]} : vector<16x160xf32> to vector<16x32xf32>
    %53 = arith.truncf %52 : vector<16x32xf32> to vector<16x32xbf16>
    %54 = vector.extract_strided_slice %51 {offsets = [0, 32], sizes = [16, 32], strides = [1, 1]} : vector<16x160xf32> to vector<16x32xf32>
    %55 = arith.truncf %54 : vector<16x32xf32> to vector<16x32xbf16>
    %56 = vector.extract_strided_slice %51 {offsets = [0, 96], sizes = [16, 32], strides = [1, 1]} : vector<16x160xf32> to vector<16x32xf32>
    %57 = arith.truncf %56 : vector<16x32xf32> to vector<16x32xbf16>
    %cst_23 = arith.constant dense<0.000000e+00> : vector<16x16xf32>
    %58 = tpu.matmul %53, %55, %cst_23 {dimension_numbers = #tpu.dot_dimension_numbers<[1], [1], [0], [0], [0, 0, 1, 0], [], []>} : vector<16x32xbf16>, vector<16x32xbf16>, vector<16x16xf32> -> vector<16x16xf32>
    %59 = arith.addf %58, %43 : vector<16x16xf32>
    %cst_24 = arith.constant dense<0xFF800000> : vector<16xf32>
    %60 = vector.multi_reduction <maximumf>, %59, %cst_24 [1] : vector<16x16xf32> to vector<16xf32>
    %61 = vector.shape_cast %60 : vector<16xf32> to vector<16x1xf32>
    %62 = vector.broadcast %61 : vector<16x1xf32> to vector<16x16xf32>
    %63 = arith.subf %59, %62 : vector<16x16xf32>
    %64 = math.exp %63 : vector<16x16xf32>
    %cst_25 = arith.constant dense<0.000000e+00> : vector<16xf32>
    %65 = vector.multi_reduction <add>, %64, %cst_25 [1] : vector<16x16xf32> to vector<16xf32>
    %66 = vector.shape_cast %65 : vector<16xf32> to vector<16x1xf32>
    %67 = tpu.reciprocal %66 {approx = true} : vector<16x1xf32> -> vector<16x1xf32>
    %68 = vector.broadcast %67 : vector<16x1xf32> to vector<16x16xf32>
    %69 = arith.mulf %64, %68 : vector<16x16xf32>
    %70 = arith.truncf %69 : vector<16x16xf32> to vector<16x16xbf16>
    %cst_26 = arith.constant dense<0.000000e+00> : vector<16x32xf32>
    %71 = tpu.matmul %70, %57, %cst_26 {dimension_numbers = #tpu.dot_dimension_numbers<[1], [0], [0], [1], [0, 0, 1, 1], [], []>} : vector<16x16xbf16>, vector<16x32xbf16>, vector<16x32xf32> -> vector<16x32xf32>
    %72 = vector.extract_strided_slice %51 {offsets = [0, 64], sizes = [16, 32], strides = [1, 1]} : vector<16x160xf32> to vector<16x32xf32>
    %73 = arith.truncf %72 : vector<16x32xf32> to vector<16x32xbf16>
    %74 = vector.extract_strided_slice %51 {offsets = [0, 128], sizes = [16, 32], strides = [1, 1]} : vector<16x160xf32> to vector<16x32xf32>
    %75 = arith.truncf %74 : vector<16x32xf32> to vector<16x32xbf16>
    %cst_27 = arith.constant dense<0.000000e+00> : vector<16x16xf32>
    %76 = tpu.matmul %53, %73, %cst_27 {dimension_numbers = #tpu.dot_dimension_numbers<[1], [1], [0], [0], [0, 0, 1, 0], [], []>} : vector<16x32xbf16>, vector<16x32xbf16>, vector<16x16xf32> -> vector<16x16xf32>
    %77 = arith.addf %76, %43 : vector<16x16xf32>
    %cst_28 = arith.constant dense<0xFF800000> : vector<16xf32>
    %78 = vector.multi_reduction <maximumf>, %77, %cst_28 [1] : vector<16x16xf32> to vector<16xf32>
    %79 = vector.shape_cast %78 : vector<16xf32> to vector<16x1xf32>
    %80 = vector.broadcast %79 : vector<16x1xf32> to vector<16x16xf32>
    %81 = arith.subf %77, %80 : vector<16x16xf32>
    %82 = math.exp %81 : vector<16x16xf32>
    %cst_29 = arith.constant dense<0.000000e+00> : vector<16xf32>
    %83 = vector.multi_reduction <add>, %82, %cst_29 [1] : vector<16x16xf32> to vector<16xf32>
    %84 = vector.shape_cast %83 : vector<16xf32> to vector<16x1xf32>
    %85 = tpu.reciprocal %84 {approx = true} : vector<16x1xf32> -> vector<16x1xf32>
    %86 = vector.broadcast %85 : vector<16x1xf32> to vector<16x16xf32>
    %87 = arith.mulf %82, %86 : vector<16x16xf32>
    %88 = arith.truncf %87 : vector<16x16xf32> to vector<16x16xbf16>
    %cst_30 = arith.constant dense<0.000000e+00> : vector<16x32xf32>
    %89 = tpu.matmul %88, %75, %cst_30 {dimension_numbers = #tpu.dot_dimension_numbers<[1], [0], [0], [1], [0, 0, 1, 1], [], []>} : vector<16x16xbf16>, vector<16x32xbf16>, vector<16x32xf32> -> vector<16x32xf32>
    %90 = arith.addf %71, %89 : vector<16x32xf32>
    %91 = arith.truncf %90 : vector<16x32xf32> to vector<16x32xbf16>
    %c0_31 = arith.constant 0 : index
    %c0_32 = arith.constant 0 : index
    %c0_33 = arith.constant 0 : index
    %92 = vector.load %arg9[%c0_31, %c0_32, %c0_33] : memref<2x32x32xbf16, #tpu.memory_space<vmem>>, vector<1x32x32xbf16>
    %93 = vector.shape_cast %92 : vector<1x32x32xbf16> to vector<32x32xbf16>
    %cst_34 = arith.constant dense<0.000000e+00> : vector<16x32xf32>
    %94 = tpu.matmul %91, %93, %cst_34 {dimension_numbers = #tpu.dot_dimension_numbers<[1], [0], [0], [1], [0, 0, 1, 1], [], []>} : vector<16x32xbf16>, vector<32x32xbf16>, vector<16x32xf32> -> vector<16x32xf32>
    %c0_35 = arith.constant 0 : index
    %c0_36 = arith.constant 0 : index
    %c0_37 = arith.constant 0 : index
    %95 = vector.load %arg10[%c0_35, %c0_36, %c0_37] : memref<2x1x32xf32, #tpu.memory_space<vmem>>, vector<1x1x32xf32>
    %96 = vector.shape_cast %95 : vector<1x1x32xf32> to vector<1x32xf32>
    %97 = vector.broadcast %96 : vector<1x32xf32> to vector<16x32xf32>
    %98 = arith.addf %94, %97 : vector<16x32xf32>
    %99 = arith.addf %42, %98 : vector<16x32xf32>
    %c0_38 = arith.constant 0 : index
    %c0_39 = arith.constant 0 : index
    %c0_40 = arith.constant 0 : index
    %100 = vector.load %arg11[%c0_38, %c0_39, %c0_40] : memref<2x1x32xf32, #tpu.memory_space<vmem>>, vector<1x1x32xf32>
    %101 = vector.shape_cast %100 : vector<1x1x32xf32> to vector<1x32xf32>
    %c0_41 = arith.constant 0 : index
    %c0_42 = arith.constant 0 : index
    %c0_43 = arith.constant 0 : index
    %102 = vector.load %arg12[%c0_41, %c0_42, %c0_43] : memref<2x1x32xf32, #tpu.memory_space<vmem>>, vector<1x1x32xf32>
    %103 = vector.shape_cast %102 : vector<1x1x32xf32> to vector<1x32xf32>
    %cst_44 = arith.constant dense<0.000000e+00> : vector<16xf32>
    %104 = vector.multi_reduction <add>, %99, %cst_44 [1] : vector<16x32xf32> to vector<16xf32>
    %105 = vector.shape_cast %104 : vector<16xf32> to vector<16x1xf32>
    %cst_45 = arith.constant 3.200000e+01 : f32
    %106 = vector.broadcast %cst_45 : f32 to vector<16x1xf32>
    %107 = arith.divf %105, %106 : vector<16x1xf32>
    %108 = vector.broadcast %107 : vector<16x1xf32> to vector<16x32xf32>
    %109 = arith.subf %99, %108 : vector<16x32xf32>
    %110 = arith.mulf %109, %109 : vector<16x32xf32>
    %cst_46 = arith.constant dense<0.000000e+00> : vector<16xf32>
    %111 = vector.multi_reduction <add>, %110, %cst_46 [1] : vector<16x32xf32> to vector<16xf32>
    %112 = vector.shape_cast %111 : vector<16xf32> to vector<16x1xf32>
    %cst_47 = arith.constant 3.200000e+01 : f32
    %113 = vector.broadcast %cst_47 : f32 to vector<16x1xf32>
    %114 = arith.divf %112, %113 : vector<16x1xf32>
    %cst_48 = arith.constant 9.99999974E-6 : f32
    %115 = vector.broadcast %cst_48 : f32 to vector<16x1xf32>
    %116 = arith.addf %114, %115 : vector<16x1xf32>
    %117 = math.rsqrt %116 : vector<16x1xf32>
    %118 = vector.broadcast %117 : vector<16x1xf32> to vector<16x32xf32>
    %119 = arith.mulf %109, %118 : vector<16x32xf32>
    %120 = vector.broadcast %101 : vector<1x32xf32> to vector<16x32xf32>
    %121 = arith.mulf %119, %120 : vector<16x32xf32>
    %122 = vector.broadcast %103 : vector<1x32xf32> to vector<16x32xf32>
    %123 = arith.addf %121, %122 : vector<16x32xf32>
    %124 = arith.truncf %123 : vector<16x32xf32> to vector<16x32xbf16>
    %c0_49 = arith.constant 0 : index
    %c0_50 = arith.constant 0 : index
    %c0_51 = arith.constant 0 : index
    %125 = vector.load %arg13[%c0_49, %c0_50, %c0_51] : memref<2x32x128xbf16, #tpu.memory_space<vmem>>, vector<1x32x128xbf16>
    %126 = vector.shape_cast %125 : vector<1x32x128xbf16> to vector<32x128xbf16>
    %cst_52 = arith.constant dense<0.000000e+00> : vector<16x128xf32>
    %127 = tpu.matmul %124, %126, %cst_52 {dimension_numbers = #tpu.dot_dimension_numbers<[1], [0], [0], [1], [0, 0, 1, 1], [], []>} : vector<16x32xbf16>, vector<32x128xbf16>, vector<16x128xf32> -> vector<16x128xf32>
    %c0_53 = arith.constant 0 : index
    %c0_54 = arith.constant 0 : index
    %c0_55 = arith.constant 0 : index
    %128 = vector.load %arg14[%c0_53, %c0_54, %c0_55] : memref<2x1x128xf32, #tpu.memory_space<vmem>>, vector<1x1x128xf32>
    %129 = vector.shape_cast %128 : vector<1x1x128xf32> to vector<1x128xf32>
    %130 = vector.broadcast %129 : vector<1x128xf32> to vector<16x128xf32>
    %131 = arith.addf %127, %130 : vector<16x128xf32>
    %cst_56 = arith.constant 5.000000e-01 : f32
    %132 = vector.broadcast %cst_56 : f32 to vector<16x128xf32>
    %133 = arith.mulf %132, %131 : vector<16x128xf32>
    %cst_57 = arith.constant 4.471500e-02 : f32
    %134 = vector.broadcast %cst_57 : f32 to vector<16x128xf32>
    %135 = arith.mulf %134, %131 : vector<16x128xf32>
    %136 = arith.mulf %135, %131 : vector<16x128xf32>
    %137 = arith.mulf %136, %131 : vector<16x128xf32>
    %138 = arith.addf %131, %137 : vector<16x128xf32>
    %cst_58 = arith.constant 0.797884583 : f32
    %139 = vector.broadcast %cst_58 : f32 to vector<16x128xf32>
    %140 = arith.mulf %139, %138 : vector<16x128xf32>
    %141 = math.tanh %140 : vector<16x128xf32>
    %cst_59 = arith.constant 1.000000e+00 : f32
    %142 = vector.broadcast %cst_59 : f32 to vector<16x128xf32>
    %143 = arith.addf %142, %141 : vector<16x128xf32>
    %144 = arith.mulf %133, %143 : vector<16x128xf32>
    %145 = arith.truncf %144 : vector<16x128xf32> to vector<16x128xbf16>
    %c0_60 = arith.constant 0 : index
    %c0_61 = arith.constant 0 : index
    %c0_62 = arith.constant 0 : index
    %146 = vector.load %arg15[%c0_60, %c0_61, %c0_62] : memref<2x128x32xbf16, #tpu.memory_space<vmem>>, vector<1x128x32xbf16>
    %147 = vector.shape_cast %146 : vector<1x128x32xbf16> to vector<128x32xbf16>
    %cst_63 = arith.constant dense<0.000000e+00> : vector<16x32xf32>
    %148 = tpu.matmul %145, %147, %cst_63 {dimension_numbers = #tpu.dot_dimension_numbers<[1], [0], [0], [1], [0, 0, 1, 1], [], []>} : vector<16x128xbf16>, vector<128x32xbf16>, vector<16x32xf32> -> vector<16x32xf32>
    %c0_64 = arith.constant 0 : index
    %c0_65 = arith.constant 0 : index
    %c0_66 = arith.constant 0 : index
    %149 = vector.load %arg16[%c0_64, %c0_65, %c0_66] : memref<2x1x32xf32, #tpu.memory_space<vmem>>, vector<1x1x32xf32>
    %150 = vector.shape_cast %149 : vector<1x1x32xf32> to vector<1x32xf32>
    %151 = vector.broadcast %150 : vector<1x32xf32> to vector<16x32xf32>
    %152 = arith.addf %148, %151 : vector<16x32xf32>
    %153 = arith.addf %123, %152 : vector<16x32xf32>
    %c0_67 = arith.constant 0 : index
    %c0_68 = arith.constant 0 : index
    %c0_69 = arith.constant 0 : index
    %154 = vector.load %arg17[%c0_67, %c0_68, %c0_69] : memref<2x1x32xf32, #tpu.memory_space<vmem>>, vector<1x1x32xf32>
    %155 = vector.shape_cast %154 : vector<1x1x32xf32> to vector<1x32xf32>
    %c0_70 = arith.constant 0 : index
    %c0_71 = arith.constant 0 : index
    %c0_72 = arith.constant 0 : index
    %156 = vector.load %arg18[%c0_70, %c0_71, %c0_72] : memref<2x1x32xf32, #tpu.memory_space<vmem>>, vector<1x1x32xf32>
    %157 = vector.shape_cast %156 : vector<1x1x32xf32> to vector<1x32xf32>
    %cst_73 = arith.constant dense<0.000000e+00> : vector<16xf32>
    %158 = vector.multi_reduction <add>, %153, %cst_73 [1] : vector<16x32xf32> to vector<16xf32>
    %159 = vector.shape_cast %158 : vector<16xf32> to vector<16x1xf32>
    %cst_74 = arith.constant 3.200000e+01 : f32
    %160 = vector.broadcast %cst_74 : f32 to vector<16x1xf32>
    %161 = arith.divf %159, %160 : vector<16x1xf32>
    %162 = vector.broadcast %161 : vector<16x1xf32> to vector<16x32xf32>
    %163 = arith.subf %153, %162 : vector<16x32xf32>
    %164 = arith.mulf %163, %163 : vector<16x32xf32>
    %cst_75 = arith.constant dense<0.000000e+00> : vector<16xf32>
    %165 = vector.multi_reduction <add>, %164, %cst_75 [1] : vector<16x32xf32> to vector<16xf32>
    %166 = vector.shape_cast %165 : vector<16xf32> to vector<16x1xf32>
    %cst_76 = arith.constant 3.200000e+01 : f32
    %167 = vector.broadcast %cst_76 : f32 to vector<16x1xf32>
    %168 = arith.divf %166, %167 : vector<16x1xf32>
    %cst_77 = arith.constant 9.99999974E-6 : f32
    %169 = vector.broadcast %cst_77 : f32 to vector<16x1xf32>
    %170 = arith.addf %168, %169 : vector<16x1xf32>
    %171 = math.rsqrt %170 : vector<16x1xf32>
    %172 = vector.broadcast %171 : vector<16x1xf32> to vector<16x32xf32>
    %173 = arith.mulf %163, %172 : vector<16x32xf32>
    %174 = vector.broadcast %155 : vector<1x32xf32> to vector<16x32xf32>
    %175 = arith.mulf %173, %174 : vector<16x32xf32>
    %176 = vector.broadcast %157 : vector<1x32xf32> to vector<16x32xf32>
    %177 = arith.addf %175, %176 : vector<16x32xf32>
    %178 = arith.truncf %177 : vector<16x32xf32> to vector<16x32xbf16>
    %c1 = arith.constant 1 : index
    %c0_78 = arith.constant 0 : index
    %c0_79 = arith.constant 0 : index
    %179 = vector.load %arg7[%c1, %c0_78, %c0_79] : memref<2x32x160xbf16, #tpu.memory_space<vmem>>, vector<1x32x160xbf16>
    %180 = vector.shape_cast %179 : vector<1x32x160xbf16> to vector<32x160xbf16>
    %cst_80 = arith.constant dense<0.000000e+00> : vector<16x160xf32>
    %181 = tpu.matmul %178, %180, %cst_80 {dimension_numbers = #tpu.dot_dimension_numbers<[1], [0], [0], [1], [0, 0, 1, 1], [], []>} : vector<16x32xbf16>, vector<32x160xbf16>, vector<16x160xf32> -> vector<16x160xf32>
    %c1_81 = arith.constant 1 : index
    %c0_82 = arith.constant 0 : index
    %c0_83 = arith.constant 0 : index
    %182 = vector.load %arg8[%c1_81, %c0_82, %c0_83] : memref<2x1x160xf32, #tpu.memory_space<vmem>>, vector<1x1x160xf32>
    %183 = vector.shape_cast %182 : vector<1x1x160xf32> to vector<1x160xf32>
    %184 = vector.broadcast %183 : vector<1x160xf32> to vector<16x160xf32>
    %185 = arith.addf %181, %184 : vector<16x160xf32>
    %186 = vector.extract_strided_slice %185 {offsets = [0, 0], sizes = [16, 32], strides = [1, 1]} : vector<16x160xf32> to vector<16x32xf32>
    %187 = arith.truncf %186 : vector<16x32xf32> to vector<16x32xbf16>
    %188 = vector.extract_strided_slice %185 {offsets = [0, 32], sizes = [16, 32], strides = [1, 1]} : vector<16x160xf32> to vector<16x32xf32>
    %189 = arith.truncf %188 : vector<16x32xf32> to vector<16x32xbf16>
    %190 = vector.extract_strided_slice %185 {offsets = [0, 96], sizes = [16, 32], strides = [1, 1]} : vector<16x160xf32> to vector<16x32xf32>
    %191 = arith.truncf %190 : vector<16x32xf32> to vector<16x32xbf16>
    %cst_84 = arith.constant dense<0.000000e+00> : vector<16x16xf32>
    %192 = tpu.matmul %187, %189, %cst_84 {dimension_numbers = #tpu.dot_dimension_numbers<[1], [1], [0], [0], [0, 0, 1, 0], [], []>} : vector<16x32xbf16>, vector<16x32xbf16>, vector<16x16xf32> -> vector<16x16xf32>
    %193 = arith.addf %192, %43 : vector<16x16xf32>
    %cst_85 = arith.constant dense<0xFF800000> : vector<16xf32>
    %194 = vector.multi_reduction <maximumf>, %193, %cst_85 [1] : vector<16x16xf32> to vector<16xf32>
    %195 = vector.shape_cast %194 : vector<16xf32> to vector<16x1xf32>
    %196 = vector.broadcast %195 : vector<16x1xf32> to vector<16x16xf32>
    %197 = arith.subf %193, %196 : vector<16x16xf32>
    %198 = math.exp %197 : vector<16x16xf32>
    %cst_86 = arith.constant dense<0.000000e+00> : vector<16xf32>
    %199 = vector.multi_reduction <add>, %198, %cst_86 [1] : vector<16x16xf32> to vector<16xf32>
    %200 = vector.shape_cast %199 : vector<16xf32> to vector<16x1xf32>
    %201 = tpu.reciprocal %200 {approx = true} : vector<16x1xf32> -> vector<16x1xf32>
    %202 = vector.broadcast %201 : vector<16x1xf32> to vector<16x16xf32>
    %203 = arith.mulf %198, %202 : vector<16x16xf32>
    %204 = arith.truncf %203 : vector<16x16xf32> to vector<16x16xbf16>
    %cst_87 = arith.constant dense<0.000000e+00> : vector<16x32xf32>
    %205 = tpu.matmul %204, %191, %cst_87 {dimension_numbers = #tpu.dot_dimension_numbers<[1], [0], [0], [1], [0, 0, 1, 1], [], []>} : vector<16x16xbf16>, vector<16x32xbf16>, vector<16x32xf32> -> vector<16x32xf32>
    %206 = vector.extract_strided_slice %185 {offsets = [0, 64], sizes = [16, 32], strides = [1, 1]} : vector<16x160xf32> to vector<16x32xf32>
    %207 = arith.truncf %206 : vector<16x32xf32> to vector<16x32xbf16>
    %208 = vector.extract_strided_slice %185 {offsets = [0, 128], sizes = [16, 32], strides = [1, 1]} : vector<16x160xf32> to vector<16x32xf32>
    %209 = arith.truncf %208 : vector<16x32xf32> to vector<16x32xbf16>
    %cst_88 = arith.constant dense<0.000000e+00> : vector<16x16xf32>
    %210 = tpu.matmul %187, %207, %cst_88 {dimension_numbers = #tpu.dot_dimension_numbers<[1], [1], [0], [0], [0, 0, 1, 0], [], []>} : vector<16x32xbf16>, vector<16x32xbf16>, vector<16x16xf32> -> vector<16x16xf32>
    %211 = arith.addf %210, %43 : vector<16x16xf32>
    %cst_89 = arith.constant dense<0xFF800000> : vector<16xf32>
    %212 = vector.multi_reduction <maximumf>, %211, %cst_89 [1] : vector<16x16xf32> to vector<16xf32>
    %213 = vector.shape_cast %212 : vector<16xf32> to vector<16x1xf32>
    %214 = vector.broadcast %213 : vector<16x1xf32> to vector<16x16xf32>
    %215 = arith.subf %211, %214 : vector<16x16xf32>
    %216 = math.exp %215 : vector<16x16xf32>
    %cst_90 = arith.constant dense<0.000000e+00> : vector<16xf32>
    %217 = vector.multi_reduction <add>, %216, %cst_90 [1] : vector<16x16xf32> to vector<16xf32>
    %218 = vector.shape_cast %217 : vector<16xf32> to vector<16x1xf32>
    %219 = tpu.reciprocal %218 {approx = true} : vector<16x1xf32> -> vector<16x1xf32>
    %220 = vector.broadcast %219 : vector<16x1xf32> to vector<16x16xf32>
    %221 = arith.mulf %216, %220 : vector<16x16xf32>
    %222 = arith.truncf %221 : vector<16x16xf32> to vector<16x16xbf16>
    %cst_91 = arith.constant dense<0.000000e+00> : vector<16x32xf32>
    %223 = tpu.matmul %222, %209, %cst_91 {dimension_numbers = #tpu.dot_dimension_numbers<[1], [0], [0], [1], [0, 0, 1, 1], [], []>} : vector<16x16xbf16>, vector<16x32xbf16>, vector<16x32xf32> -> vector<16x32xf32>
    %224 = arith.addf %205, %223 : vector<16x32xf32>
    %225 = arith.truncf %224 : vector<16x32xf32> to vector<16x32xbf16>
    %c1_92 = arith.constant 1 : index
    %c0_93 = arith.constant 0 : index
    %c0_94 = arith.constant 0 : index
    %226 = vector.load %arg9[%c1_92, %c0_93, %c0_94] : memref<2x32x32xbf16, #tpu.memory_space<vmem>>, vector<1x32x32xbf16>
    %227 = vector.shape_cast %226 : vector<1x32x32xbf16> to vector<32x32xbf16>
    %cst_95 = arith.constant dense<0.000000e+00> : vector<16x32xf32>
    %228 = tpu.matmul %225, %227, %cst_95 {dimension_numbers = #tpu.dot_dimension_numbers<[1], [0], [0], [1], [0, 0, 1, 1], [], []>} : vector<16x32xbf16>, vector<32x32xbf16>, vector<16x32xf32> -> vector<16x32xf32>
    %c1_96 = arith.constant 1 : index
    %c0_97 = arith.constant 0 : index
    %c0_98 = arith.constant 0 : index
    %229 = vector.load %arg10[%c1_96, %c0_97, %c0_98] : memref<2x1x32xf32, #tpu.memory_space<vmem>>, vector<1x1x32xf32>
    %230 = vector.shape_cast %229 : vector<1x1x32xf32> to vector<1x32xf32>
    %231 = vector.broadcast %230 : vector<1x32xf32> to vector<16x32xf32>
    %232 = arith.addf %228, %231 : vector<16x32xf32>
    %233 = arith.addf %177, %232 : vector<16x32xf32>
    %c1_99 = arith.constant 1 : index
    %c0_100 = arith.constant 0 : index
    %c0_101 = arith.constant 0 : index
    %234 = vector.load %arg11[%c1_99, %c0_100, %c0_101] : memref<2x1x32xf32, #tpu.memory_space<vmem>>, vector<1x1x32xf32>
    %235 = vector.shape_cast %234 : vector<1x1x32xf32> to vector<1x32xf32>
    %c1_102 = arith.constant 1 : index
    %c0_103 = arith.constant 0 : index
    %c0_104 = arith.constant 0 : index
    %236 = vector.load %arg12[%c1_102, %c0_103, %c0_104] : memref<2x1x32xf32, #tpu.memory_space<vmem>>, vector<1x1x32xf32>
    %237 = vector.shape_cast %236 : vector<1x1x32xf32> to vector<1x32xf32>
    %cst_105 = arith.constant dense<0.000000e+00> : vector<16xf32>
    %238 = vector.multi_reduction <add>, %233, %cst_105 [1] : vector<16x32xf32> to vector<16xf32>
    %239 = vector.shape_cast %238 : vector<16xf32> to vector<16x1xf32>
    %cst_106 = arith.constant 3.200000e+01 : f32
    %240 = vector.broadcast %cst_106 : f32 to vector<16x1xf32>
    %241 = arith.divf %239, %240 : vector<16x1xf32>
    %242 = vector.broadcast %241 : vector<16x1xf32> to vector<16x32xf32>
    %243 = arith.subf %233, %242 : vector<16x32xf32>
    %244 = arith.mulf %243, %243 : vector<16x32xf32>
    %cst_107 = arith.constant dense<0.000000e+00> : vector<16xf32>
    %245 = vector.multi_reduction <add>, %244, %cst_107 [1] : vector<16x32xf32> to vector<16xf32>
    %246 = vector.shape_cast %245 : vector<16xf32> to vector<16x1xf32>
    %cst_108 = arith.constant 3.200000e+01 : f32
    %247 = vector.broadcast %cst_108 : f32 to vector<16x1xf32>
    %248 = arith.divf %246, %247 : vector<16x1xf32>
    %cst_109 = arith.constant 9.99999974E-6 : f32
    %249 = vector.broadcast %cst_109 : f32 to vector<16x1xf32>
    %250 = arith.addf %248, %249 : vector<16x1xf32>
    %251 = math.rsqrt %250 : vector<16x1xf32>
    %252 = vector.broadcast %251 : vector<16x1xf32> to vector<16x32xf32>
    %253 = arith.mulf %243, %252 : vector<16x32xf32>
    %254 = vector.broadcast %235 : vector<1x32xf32> to vector<16x32xf32>
    %255 = arith.mulf %253, %254 : vector<16x32xf32>
    %256 = vector.broadcast %237 : vector<1x32xf32> to vector<16x32xf32>
    %257 = arith.addf %255, %256 : vector<16x32xf32>
    %258 = arith.truncf %257 : vector<16x32xf32> to vector<16x32xbf16>
    %c1_110 = arith.constant 1 : index
    %c0_111 = arith.constant 0 : index
    %c0_112 = arith.constant 0 : index
    %259 = vector.load %arg13[%c1_110, %c0_111, %c0_112] : memref<2x32x128xbf16, #tpu.memory_space<vmem>>, vector<1x32x128xbf16>
    %260 = vector.shape_cast %259 : vector<1x32x128xbf16> to vector<32x128xbf16>
    %cst_113 = arith.constant dense<0.000000e+00> : vector<16x128xf32>
    %261 = tpu.matmul %258, %260, %cst_113 {dimension_numbers = #tpu.dot_dimension_numbers<[1], [0], [0], [1], [0, 0, 1, 1], [], []>} : vector<16x32xbf16>, vector<32x128xbf16>, vector<16x128xf32> -> vector<16x128xf32>
    %c1_114 = arith.constant 1 : index
    %c0_115 = arith.constant 0 : index
    %c0_116 = arith.constant 0 : index
    %262 = vector.load %arg14[%c1_114, %c0_115, %c0_116] : memref<2x1x128xf32, #tpu.memory_space<vmem>>, vector<1x1x128xf32>
    %263 = vector.shape_cast %262 : vector<1x1x128xf32> to vector<1x128xf32>
    %264 = vector.broadcast %263 : vector<1x128xf32> to vector<16x128xf32>
    %265 = arith.addf %261, %264 : vector<16x128xf32>
    %cst_117 = arith.constant 5.000000e-01 : f32
    %266 = vector.broadcast %cst_117 : f32 to vector<16x128xf32>
    %267 = arith.mulf %266, %265 : vector<16x128xf32>
    %cst_118 = arith.constant 4.471500e-02 : f32
    %268 = vector.broadcast %cst_118 : f32 to vector<16x128xf32>
    %269 = arith.mulf %268, %265 : vector<16x128xf32>
    %270 = arith.mulf %269, %265 : vector<16x128xf32>
    %271 = arith.mulf %270, %265 : vector<16x128xf32>
    %272 = arith.addf %265, %271 : vector<16x128xf32>
    %cst_119 = arith.constant 0.797884583 : f32
    %273 = vector.broadcast %cst_119 : f32 to vector<16x128xf32>
    %274 = arith.mulf %273, %272 : vector<16x128xf32>
    %275 = math.tanh %274 : vector<16x128xf32>
    %cst_120 = arith.constant 1.000000e+00 : f32
    %276 = vector.broadcast %cst_120 : f32 to vector<16x128xf32>
    %277 = arith.addf %276, %275 : vector<16x128xf32>
    %278 = arith.mulf %267, %277 : vector<16x128xf32>
    %279 = arith.truncf %278 : vector<16x128xf32> to vector<16x128xbf16>
    %c1_121 = arith.constant 1 : index
    %c0_122 = arith.constant 0 : index
    %c0_123 = arith.constant 0 : index
    %280 = vector.load %arg15[%c1_121, %c0_122, %c0_123] : memref<2x128x32xbf16, #tpu.memory_space<vmem>>, vector<1x128x32xbf16>
    %281 = vector.shape_cast %280 : vector<1x128x32xbf16> to vector<128x32xbf16>
    %cst_124 = arith.constant dense<0.000000e+00> : vector<16x32xf32>
    %282 = tpu.matmul %279, %281, %cst_124 {dimension_numbers = #tpu.dot_dimension_numbers<[1], [0], [0], [1], [0, 0, 1, 1], [], []>} : vector<16x128xbf16>, vector<128x32xbf16>, vector<16x32xf32> -> vector<16x32xf32>
    %c1_125 = arith.constant 1 : index
    %c0_126 = arith.constant 0 : index
    %c0_127 = arith.constant 0 : index
    %283 = vector.load %arg16[%c1_125, %c0_126, %c0_127] : memref<2x1x32xf32, #tpu.memory_space<vmem>>, vector<1x1x32xf32>
    %284 = vector.shape_cast %283 : vector<1x1x32xf32> to vector<1x32xf32>
    %285 = vector.broadcast %284 : vector<1x32xf32> to vector<16x32xf32>
    %286 = arith.addf %282, %285 : vector<16x32xf32>
    %287 = arith.addf %257, %286 : vector<16x32xf32>
    %c1_128 = arith.constant 1 : index
    %c0_129 = arith.constant 0 : index
    %c0_130 = arith.constant 0 : index
    %288 = vector.load %arg17[%c1_128, %c0_129, %c0_130] : memref<2x1x32xf32, #tpu.memory_space<vmem>>, vector<1x1x32xf32>
    %289 = vector.shape_cast %288 : vector<1x1x32xf32> to vector<1x32xf32>
    %c1_131 = arith.constant 1 : index
    %c0_132 = arith.constant 0 : index
    %c0_133 = arith.constant 0 : index
    %290 = vector.load %arg18[%c1_131, %c0_132, %c0_133] : memref<2x1x32xf32, #tpu.memory_space<vmem>>, vector<1x1x32xf32>
    %291 = vector.shape_cast %290 : vector<1x1x32xf32> to vector<1x32xf32>
    %cst_134 = arith.constant dense<0.000000e+00> : vector<16xf32>
    %292 = vector.multi_reduction <add>, %287, %cst_134 [1] : vector<16x32xf32> to vector<16xf32>
    %293 = vector.shape_cast %292 : vector<16xf32> to vector<16x1xf32>
    %cst_135 = arith.constant 3.200000e+01 : f32
    %294 = vector.broadcast %cst_135 : f32 to vector<16x1xf32>
    %295 = arith.divf %293, %294 : vector<16x1xf32>
    %296 = vector.broadcast %295 : vector<16x1xf32> to vector<16x32xf32>
    %297 = arith.subf %287, %296 : vector<16x32xf32>
    %298 = arith.mulf %297, %297 : vector<16x32xf32>
    %cst_136 = arith.constant dense<0.000000e+00> : vector<16xf32>
    %299 = vector.multi_reduction <add>, %298, %cst_136 [1] : vector<16x32xf32> to vector<16xf32>
    %300 = vector.shape_cast %299 : vector<16xf32> to vector<16x1xf32>
    %cst_137 = arith.constant 3.200000e+01 : f32
    %301 = vector.broadcast %cst_137 : f32 to vector<16x1xf32>
    %302 = arith.divf %300, %301 : vector<16x1xf32>
    %cst_138 = arith.constant 9.99999974E-6 : f32
    %303 = vector.broadcast %cst_138 : f32 to vector<16x1xf32>
    %304 = arith.addf %302, %303 : vector<16x1xf32>
    %305 = math.rsqrt %304 : vector<16x1xf32>
    %306 = vector.broadcast %305 : vector<16x1xf32> to vector<16x32xf32>
    %307 = arith.mulf %297, %306 : vector<16x32xf32>
    %308 = vector.broadcast %289 : vector<1x32xf32> to vector<16x32xf32>
    %309 = arith.mulf %307, %308 : vector<16x32xf32>
    %310 = vector.broadcast %291 : vector<1x32xf32> to vector<16x32xf32>
    %311 = arith.addf %309, %310 : vector<16x32xf32>
    %312 = vector.shape_cast %311 : vector<16x32xf32> to vector<2x8x32xf32>
    %313 = vector.extract_strided_slice %312 {offsets = [0, 0, 0], sizes = [2, 1, 32], strides = [1, 1, 1]} : vector<2x8x32xf32> to vector<2x1x32xf32>
    %314 = vector.shape_cast %313 : vector<2x1x32xf32> to vector<2x32xf32>
    %315 = arith.truncf %314 : vector<2x32xf32> to vector<2x32xbf16>
    %c0_139 = arith.constant 0 : index
    %c0_140 = arith.constant 0 : index
    %316 = vector.load %arg19[%c0_139, %c0_140] : memref<32x8xbf16, #tpu.memory_space<vmem>>, vector<32x8xbf16>
    %cst_141 = arith.constant dense<0.000000e+00> : vector<2x8xf32>
    %317 = tpu.matmul %315, %316, %cst_141 {dimension_numbers = #tpu.dot_dimension_numbers<[1], [0], [0], [1], [0, 0, 1, 1], [], []>} : vector<2x32xbf16>, vector<32x8xbf16>, vector<2x8xf32> -> vector<2x8xf32>
    %c0_142 = arith.constant 0 : index
    %c0_143 = arith.constant 0 : index
    %318 = vector.load %arg20[%c0_142, %c0_143] : memref<1x8xf32, #tpu.memory_space<vmem>>, vector<1x8xf32>
    %319 = vector.broadcast %318 : vector<1x8xf32> to vector<2x8xf32>
    %320 = arith.addf %317, %319 : vector<2x8xf32>
    %cst_144 = arith.constant 0.000000e+00 : f32
    %321 = vector.broadcast %cst_144 : f32 to vector<2x8xf32>
    %322 = arith.maximumf %320, %321 : vector<2x8xf32>
    %323 = arith.truncf %322 : vector<2x8xf32> to vector<2x8xbf16>
    %c0_145 = arith.constant 0 : index
    %c0_146 = arith.constant 0 : index
    %324 = vector.load %arg21[%c0_145, %c0_146] : memref<8x7xbf16, #tpu.memory_space<vmem>>, vector<8x7xbf16>
    %cst_147 = arith.constant dense<0.000000e+00> : vector<2x7xf32>
    %325 = tpu.matmul %323, %324, %cst_147 {dimension_numbers = #tpu.dot_dimension_numbers<[1], [0], [0], [1], [0, 0, 1, 1], [], []>} : vector<2x8xbf16>, vector<8x7xbf16>, vector<2x7xf32> -> vector<2x7xf32>
    %c0_148 = arith.constant 0 : index
    %c0_149 = arith.constant 0 : index
    %326 = vector.load %arg22[%c0_148, %c0_149] : memref<1x7xf32, #tpu.memory_space<vmem>>, vector<1x7xf32>
    %327 = vector.broadcast %326 : vector<1x7xf32> to vector<2x7xf32>
    %328 = arith.addf %325, %327 : vector<2x7xf32>
    %329 = arith.negf %328 : vector<2x7xf32>
    %330 = math.exp %329 : vector<2x7xf32>
    %cst_150 = arith.constant 1.000000e+00 : f32
    %331 = vector.broadcast %cst_150 : f32 to vector<2x7xf32>
    %332 = arith.addf %331, %330 : vector<2x7xf32>
    %333 = arith.divf %331, %332 : vector<2x7xf32>
    %c0_151 = arith.constant 0 : index
    %c0_152 = arith.constant 0 : index
    %334 = vector.load %arg23[%c0_151, %c0_152] : memref<2x7xf32, #tpu.memory_space<vmem>>, vector<2x7xf32>
    tpu.vector_store %arg23[%c0_151, %c0_152], %333 {strides = array<i32>} : memref<2x7xf32, #tpu.memory_space<vmem>>, vector<2x7xf32>,
    %335 = tpu.iota {dimensions = array<i32: 1>} : vector<2x7xi32>
    %c0_153 = arith.constant 0 : index
    %c0_154 = arith.constant 0 : index
    %336 = vector.load %arg2[%c0_153, %c0_154] : memref<2x1xi32, #tpu.memory_space<vmem>>, vector<2x1xi32>
    %337 = vector.broadcast %336 : vector<2x1xi32> to vector<2x7xi32>
    %338 = arith.cmpi eq, %335, %337 : vector<2x7xi32>
    %339 = arith.extui %338 : vector<2x7xi1> to vector<2x7xi32>
    %340 = arith.sitofp %339 : vector<2x7xi32> to vector<2x7xf32>
    %cst_155 = arith.constant 9.99999996E-13 : f32
    %341 = vector.broadcast %cst_155 : f32 to vector<2x7xf32>
    %342 = arith.addf %333, %341 : vector<2x7xf32>
    %343 = math.log %342 : vector<2x7xf32>
    %344 = arith.mulf %340, %343 : vector<2x7xf32>
    %cst_156 = arith.constant 1.000000e+00 : f32
    %345 = vector.broadcast %cst_156 : f32 to vector<2x7xf32>
    %346 = arith.subf %345, %340 : vector<2x7xf32>
    %cst_157 = arith.constant 1.000000e+00 : f32
    %347 = vector.broadcast %cst_157 : f32 to vector<2x7xf32>
    %348 = arith.subf %347, %333 : vector<2x7xf32>
    %cst_158 = arith.constant 9.99999996E-13 : f32
    %349 = vector.broadcast %cst_158 : f32 to vector<2x7xf32>
    %350 = arith.addf %348, %349 : vector<2x7xf32>
    %351 = math.log %350 : vector<2x7xf32>
    %352 = arith.mulf %346, %351 : vector<2x7xf32>
    %353 = arith.addf %344, %352 : vector<2x7xf32>
    %cst_159 = arith.constant 0.000000e+00 : f32
    %354 = vector.broadcast %cst_159 : f32 to vector<2x7xf32>
    %355 = arith.subf %354, %353 : vector<2x7xf32>
    %356 = vector.shape_cast %355 : vector<2x7xf32> to vector<1x2x7xf32>
    %cst_160 = arith.constant dense<0.000000e+00> : vector<1xf32>
    %357 = vector.multi_reduction <add>, %356, %cst_160 [1, 2] : vector<1x2x7xf32> to vector<1xf32>
    %358 = vector.shape_cast %357 : vector<1xf32> to vector<1x1x1xf32>
    %359 = vector.extract %358[0, 0, 0] : f32 from vector<1x1x1xf32>
    %cst_161 = arith.constant 1.400000e+01 : f32
    %360 = arith.divf %359, %cst_161 : f32
    %cst_162 = arith.constant 1.000000e+00 : f32
    %361 = vector.broadcast %cst_162 : f32 to vector<1x1xf32>
    %362 = vector.broadcast %360 : f32 to vector<1x1xf32>
    %363 = arith.mulf %362, %361 : vector<1x1xf32>
    %c0_163 = arith.constant 0 : index
    %c0_164 = arith.constant 0 : index
    %364 = vector.load %arg24[%c0_163, %c0_164] : memref<1x1xf32, #tpu.memory_space<vmem>>, vector<1x1xf32>
    tpu.vector_store %arg24[%c0_163, %c0_164], %363 {strides = array<i32>} : memref<1x1xf32, #tpu.memory_space<vmem>>, vector<1x1xf32>,
    return
  }
}

</mosaic_0001>

<bundles_post_ra>
// kernel: naive_roberta_forward.1
= control target key start
LH: loop header
LB: loop body
LE: loop exit
PB: predicated region body
PF: predicated region fallthrough
CT: control target
= control target key end

     0   :  { %s2891_s0 = inlined_call_operand.vmem [shape: s32[16,1], index: 0, kind: input, shape index: {}]   ;;  %s2892_s1 = inlined_call_operand.vmem [shape: s32[16,1], index: 1, kind: input, shape index: {}]   ;;  %s2893_s2 = inlined_call_operand.vmem [shape: s32[2,1], index: 2, kind: input, shape index: {}]   ;;  %s2894_s3 = inlined_call_operand.vmem [shape: f32[16,16], index: 3, kind: input, shape index: {}]   ;;  %s2895_s4 = inlined_call_operand.vmem [shape: f32[62,32], index: 4, kind: input, shape index: {}]   ;;  %s2896_s5 = inlined_call_operand.vmem [shape: f32[1,32], index: 5, kind: input, shape index: {}]   ;;  %s2897_s6 = inlined_call_operand.vmem [shape: f32[1,32], index: 6, kind: input, shape index: {}]   ;;  %s2898_s7 = inlined_call_operand.vmem [shape: bf16[2,32,160], index: 7, kind: input, shape index: {}]   ;;  %s2899_s8 = inlined_call_operand.vmem [shape: f32[2,1,160], index: 8, kind: input, shape index: {}]   ;;  %s2900_s9 = inlined_call_operand.vmem [shape: bf16[2,32,32], index: 9, kind: input, shape index: {}]   ;;  %s2901_s10 = inlined_call_operand.vmem [shape: f32[2,1,32], index: 10, kind: input, shape index: {}]   ;;  %s2902_s11 = inlined_call_operand.vmem [shape: f32[2,1,32], index: 11, kind: input, shape index: {}]   ;;  %s2903_s12 = inlined_call_operand.vmem [shape: f32[2,1,32], index: 12, kind: input, shape index: {}]   ;;  %s2904_s13 = inlined_call_operand.vmem [shape: bf16[2,32,128], index: 13, kind: input, shape index: {}]   ;;  %s2905_s14 = inlined_call_operand.vmem [shape: f32[2,1,128], index: 14, kind: input, shape index: {}]   ;;  %s2906_s15 = inlined_call_operand.vmem [shape: bf16[2,128,32], index: 15, kind: input, shape index: {}]   ;;  %s2907_s16 = inlined_call_operand.vmem [shape: f32[2,1,32], index: 16, kind: input, shape index: {}]   ;;  %s2908_s17 = inlined_call_operand.vmem [shape: f32[2,1,32], index: 17, kind: input, shape index: {}]   ;;  %s2909_s18 = inlined_call_operand.vmem [shape: f32[2,1,32], index: 18, kind: input, shape index: {}]   ;;  %s2910_s19 = inlined_call_operand.vmem [shape: bf16[32,8], index: 19, kind: input, shape index: {}]   ;;  %s2911_s20 = inlined_call_operand.vmem [shape: f32[1,8], index: 20, kind: input, shape index: {}]   ;;  %s2912_s21 = inlined_call_operand.vmem [shape: bf16[8,7], index: 21, kind: input, shape index: {}]   ;;  %s2913_s22 = inlined_call_operand.vmem [shape: f32[1,7], index: 22, kind: input, shape index: {}]   ;;  %s2914_s23 = inlined_call_operand.hbm [shape: f32[2,7], index: 23, kind: output, shape index: {0}]   ;;  %s2915_s24 = inlined_call_operand.hbm [shape: f32[1,1], index: 24, kind: output, shape index: {1}]  }
   0x1   :  { %2922 = sst [smem:[#allocation8_spill]] %s2891_s0 }
   0x2   :  { %2923 = sst [smem:[#allocation9_spill]] %s2892_s1 }
   0x3   :  { %2924 = sst [smem:[#allocation10_spill]] %s2893_s2 }
   0x4   :  { %2925 = sst [smem:[#allocation11_spill]] %s2894_s3 }
   0x5   :  { %2926 = sst [smem:[#allocation12_spill]] %s2895_s4 }
   0x6   :  { %2927 = sst [smem:[#allocation13_spill]] %s2896_s5 }
   0x7   :  { %2928 = sst [smem:[#allocation14_spill]] %s2897_s6 }
   0x8   :  { %2929 = sst [smem:[#allocation15_spill]] %s2898_s7 }
   0x9   :  { %2930 = sst [smem:[#allocation16_spill]] %s2899_s8 }
   0xa   :  { %30 = vsyncpa [#allocation3], 0  ;;  %s2931_s27 = sld [smem:[#allocation8_spill]]  ;;  %vm133_vm0 = vcmask 1045504   ;;  %v2322_v3 = vmov 0   ;;  %v2323_v15 = vmov 0.0  }
   0xb   :  { %s2932_s0 = sld [smem:[#allocation9_spill]]  ;;  %2171 = vset.pattern.permute.xlu1 %v2322_v3  ;;  %2170 = vset.pattern.permute.xlu0 %v2322_v3 }
   0xc   :  { %s2933_s8 = sld [smem:[#allocation12_spill]]  ;;  %332 = vmatprep.mubr.bf16.mxu1 %v2322_v3 }
  0x10   :  { %v82_v0 = vld [vmem:[%s2931_s27 + $0x8] sm:$0xff]  ;;  %v81_v1 = vld [vmem:[%s2931_s27] sm:$0xff] }
  0x11   :  { %v96_v2 = vld [vmem:[%s2932_s0 + $0x8] sm:$0xff]  ;;  %v95_v4 = vld [vmem:[%s2932_s0] sm:$0xff]  ;;  %87 = vperm.xlu1 %2171, %v82_v0   ;;  %84 = vperm.xlu0 %2170, %v81_v1  }
  0x12   :  { %v125_v5 = vld [vmem:[%s2933_s8 + $0x38] sm:$0x3f]  ;;  %v98_v6 = vadd.s32 50, %v96_v2  ;;  %v97_v7 = vadd.s32 50, %v95_v4  ;;  %v124_v8 = vld [vmem:[%s2933_s8 + $0x30] sm:$0xff]  ;;  %v123_v9 = vld [vmem:[%s2933_s8 + $0x28] sm:$0xff] }
  0x13   :  { %2007 = vmatprep.subr.msk.mxu0 %vm133_vm0, %v125_v5  ;;  %v122_v10 = vld [vmem:[%s2933_s8 + $0x20] sm:$0xff]  ;;  %v121_v11 = vld [vmem:[%s2933_s8 + $0x18] sm:$0xff]  ;;  %v120_v12 = vld [vmem:[%s2933_s8 + $0x10] sm:$0xff] }
  0x14   :  { %2008 = vmatpush3.msk.msra.mxu0 %vm133_vm0, %v125_v5  ;;  %v119_v13 = vld [vmem:[%s2933_s8 + $0x8] sm:$0xff]  ;;  %v118_v14 = vld [vmem:[%s2933_s8] sm:$0xff] }
  0x15   :  { %2009 = vmatprep.subr.mxu0 %v124_v8  ;;  %103 = vperm.xlu1 %2171, %v98_v6  }
  0x16   :  { %100 = vperm.xlu0 %2170, %v97_v7   ;;  %2010 = vmatpush3.msra.mxu0 %v124_v8 }
  0x17   :  { %2011 = vmatprep.subr.mxu0 %v123_v9 }
  0x18   :  { %2012 = vmatpush3.msra.mxu0 %v123_v9 }
  0x19   :  { %2013 = vmatprep.subr.mxu0 %v122_v10 }
  0x1a   :  { %2014 = vmatpush3.msra.mxu0 %v122_v10 }
  0x1b   :  { %2015 = vmatprep.subr.mxu0 %v121_v11 }
  0x1c   :  { %2016 = vmatpush3.msra.mxu0 %v121_v11 }
  0x1d   :  { %2017 = vmatprep.subr.mxu0 %v120_v12 }
  0x1e   :  { %2018 = vmatpush3.msra.mxu0 %v120_v12 }
  0x1f   :  { %2019 = vmatprep.subr.mxu0 %v119_v13 }
  0x20   :  { %2020 = vmatpush3.msra.mxu0 %v119_v13 }
  0x21   :  { %2021 = vmatprep.subr.mxu0 %v118_v14 }
  0x22   :  { %2022 = vmatpush3.msra.mxu0 %v118_v14 }
  0x23   :  { %2044 = vmatprep.subr.bf16.mxu0 %v2323_v15 }
  0x24   :  { %31 = vsyncpa [#allocation5], 0  ;;  %v79_v16 = vlaneseq  ;;  %vm126_vm6 = vcmask 506880   ;;  %vm214_vm7 = vcmask 261120   ;;  %s2934_s1 = sld [smem:[#allocation15_spill]]  ;;  %vm2324_vm8 = vmmov 0  }
  0x25   :  { %s2935_s7 = sld [smem:[#allocation13_spill]]  ;;  %s2325_s26 = smov 64   ;;  %vm394_vm9 = vcmask 130048   ;;  %vm1645_vm10 = vcmask 1041409   ;;  %vm1717_vm11 = vcmask 1043456   ;;  %vm1713_vm12 = vcmask 64512  }
  0x26   :  { %v2496_v17 = vand.u32 127, %v79_v16  ;;  %s2936_s25 = sld [smem:[#allocation14_spill]]  ;;  %v2539_v2 = vshrl.u32 %v79_v16, 7  ;;  %s2326_s27 = smov 96   ;;  %vm1767_vm13 = vcmask 50176  }
  0x27   :  { %s2937_s5 = sld [smem:[#allocation16_spill]] }
  0x28   :  { %vm113_vm1 = vcmp.eq.s32.totalorder %v2496_v17, 61  ;;  %v269_v4 = vsub.s32 0, %v2539_v2  ;;  %v273_v16 = vsub.s32 1, %v2539_v2  ;;  %s2938_s2 = sld [smem:[#allocation11_spill]] }
  0x29   :  { %v1836_v22 = vsel %vm113_vm1, 1.0, %v2323_v15  ;;  %s2939_s8 = sld [smem:[#allocation10_spill]] }
  0x2a   :  { %v2172_v45 = vld [vmem:[%s2934_s1 + $0x14] ss:$8 sps:$4 sm:$0xff]   ;;  %v2174_v46 = vld [vmem:[%s2934_s1 + $0x10] ss:$8 sps:$4 sm:$0xff]   ;;  %v2175_v47 = vld [vmem:[%s2934_s1 + $0x4] ss:$8 sps:$4 sm:$0xff]  }
  0x2b   :  { %312 = vmatprep.subr.bf16.mxu1 %v2172_v45  ;;  %v2177_v48 = vld [vmem:[%s2934_s1] ss:$8 sps:$4 sm:$0xff]  }
  0x2c   :  { %313 = vmatpush1.bf16.msra.mxu1 %v2174_v46  ;;  %v1840_v57 = vld [vmem:[%s2935_s7] ss:$0 sm:$0xff]  ;;  %s2327_s7 = smov 32  }
  0x2d   :  { %314 = vmatprep.subr.bf16.mxu1 %v2175_v47  ;;  %v1841_v61 = vld [vmem:[%s2936_s25] ss:$0 sm:$0xff] }
  0x2e   :  { %v265_v5 = vld [vmem:[%s2937_s5] sm:$0x3] }
  0x2f   :  { %v270_v7 = vrot.slane %v265_v5, %v269_v4 }
  0x30   :  { %315 = vmatpush1.bf16.msra.mxu1 %v2177_v48 }
  0x31   :  { %2026 = vmatprep.subr.bf16.mxu1 %v2323_v15 }
  0x8c   :  { %v88_v18 = vpop.permute.xlu1 %87  ;;  %v85_v19 = vpop.permute.xlu0 %84 }
  0x8d   :  { %vm90_vm2 = vcmp.eq.s32.totalorder %v2496_v17, %v88_v18  ;;  %vm89_vm3 = vcmp.eq.s32.totalorder %v2496_v17, %v85_v19 }
  0x8e   :  { %v1833_v23 = vsel %vm90_vm2, 1.0, %v2323_v15  ;;  %v1832_v24 = vsel %vm89_vm3, 1.0, %v2323_v15 }
  0x90   :  { %v104_v20 = vpop.permute.xlu1 %103 }
  0x91   :  { %v101_v21 = vpop.permute.xlu0 %100  ;;  %vm106_vm4 = vcmp.eq.s32.totalorder %v2496_v17, %v104_v20 }
  0x92   :  { %vm105_vm5 = vcmp.eq.s32.totalorder %v2496_v17, %v101_v21  ;;  %v1835_v25 = vsel %vm106_vm4, 1.0, %v2323_v15  ;;  %v274_v21 = vrot.slane %v265_v5, %v273_v16 }
  0x93   :  { %v1834_v26 = vsel %vm105_vm5, 1.0, %v2323_v15  ;;  %v112_v27 = vadd.f32 %v1835_v25, %v1833_v23  ;;  %v2576_v25 = vld [vmem:[%s2938_s2] sm:$0xff] }
  0x94   :  { %v111_v28 = vadd.f32 %v1834_v26, %v1832_v24 }
  0x95   :  { %v117_v30 = vadd.f32 %v1836_v22, %v112_v27 }
  0x96   :  { %v116_v29 = vadd.f32 %v1836_v22, %v111_v28 }
  0x98   :  { %2023 = vmatprep.mubr.msk.f32.mxu0 %vm126_vm6, %v116_v29  ;;  %v2582_v29 = vld [vmem:[%s2938_s2 + $0x8] sm:$0xff] }
  0x99   :  { %2024 = vmatmul.mubr.msk.f32.vlgmr.msra.gmra.mxu0 %vm126_vm6, %v117_v30 }
  0x9a   :  { %2046 = vmatprep.mubr.msk.bf16.mxu0 %vm2324_vm8, %v2323_v15 }
 0x159   :  { %v2025_v31 = vpop.f32.mrf.mxu0 }
 0x15a   :  { %v218_v32 = vsel %vm214_vm7, %v2025_v31, 0.0 }
 0x15b   :  { %219 = vadd.xlane.f32.xlu1 %v218_v32  ;;  %v203_v33 = vpop.f32.mrf.mxu0 }
 0x15c   :  { %v215_v34 = vsel %vm214_vm7, %v203_v33, 0.0 }
 0x15d   :  { %216 = vadd.xlane.f32.xlu0 %v215_v34 }
 0x1e4   :  { %v220_v35 = vpop.xlane.xlu1 %219 }
 0x1e5   :  { %v223_v36 = vmul.f32 0.03125, %v220_v35 }
 0x1e6   :  { %v217_v37 = vpop.xlane.xlu0 %216 }
 0x1e7   :  { %v222_v38 = vmul.f32 0.03125, %v217_v37  ;;  %v225_v39 = vsub.f32 %v2025_v31, %v223_v36 }
 0x1e9   :  { %v224_v40 = vsub.f32 %v203_v33, %v222_v38  ;;  %v227_v43 = vmul.f32 %v225_v39, %v225_v39 }
 0x1eb   :  { %v226_v41 = vmul.f32 %v224_v40, %v224_v40  ;;  %v231_v44 = vsel %vm214_vm7, %v227_v43, 0.0 }
 0x1ed   :  { %v228_v42 = vsel %vm214_vm7, %v226_v41, 0.0 }
 0x1ee   :  { %229 = vadd.xlane.f32.xlu0 %v228_v42 }
 0x1f2   :  { %232 = vadd.xlane.f32.xlu0 %v231_v44 }
 0x277   :  { %v230_v49 = vpop.xlane.xlu0 %229 }
 0x278   :  { %v234_v50 = vmul.f32 0.03125, %v230_v49 }
 0x27a   :  { %v236_v51 = vadd.f32 1e-05, %v234_v50 }
 0x27b   :  { %v233_v52 = vpop.xlane.xlu0 %232 }
 0x27c   :  { %2210 = vrsqrt.f32 %v236_v51  ;;  %v235_v53 = vmul.f32 0.03125, %v233_v52 }
 0x27e   :  { %v237_v54 = vadd.f32 1e-05, %v235_v53 }
 0x280   :  { %2212 = vrsqrt.f32 %v237_v54 }
 0x289   :  { %v2211_v55 = vpop.eup %2210 }
 0x28a   :  { %v240_v56 = vmul.f32 %v2211_v55, %v224_v40 }
 0x28c   :  { %v248_v60 = vmul.f32 %v1840_v57, %v240_v56 }
 0x28d   :  { %v2213_v58 = vpop.eup %2212 }
 0x28e   :  { %v241_v59 = vmul.f32 %v2213_v58, %v225_v39  ;;  %v2531_v63 = vadd.f32 %v1841_v61, %v248_v60 }
 0x290   :  { %v249_v62 = vmul.f32 %v1840_v57, %v241_v59 }
 0x292   :  { %v2533_v0 = vadd.f32 %v1841_v61, %v249_v62 }
 0x294   :  { %v260_v1 = vpack.c.bf16 %v2533_v0, %v2531_v63 }
 0x296   :  { %1846 = vmatmul.mubr.msk.bf16.vlgmr.msra.gmra.mxu1 %vm214_vm7, %v260_v1 }
 0x297   :  { %2028 = vmatprep.mubr.msk.bf16.mxu1 %vm2324_vm8, %v2323_v15 }
 0x356   :  { %v334_v6 = vpop.f32.mrf.mxu1 }
 0x357   :  { %v335_v10 = vadd.f32 %v334_v6, %v270_v7 }
 0x358   :  { %v336_v8 = vpop.f32.mrf.mxu1 }
 0x359   :  { %v337_v23 = vadd.f32 %v336_v8, %v274_v21 }
 0x35a   :  { %v338_v9 = vpop.f32.mrf.mxu1 }
 0x35b   :  { %v339_v11 = vadd.f32 %v338_v9, %v270_v7 }
 0x35c   :  { %v340_v19 = vpop.f32.mrf.mxu1 }
 0x35d   :  { %v2551_v12 = vpack.c.bf16 %v339_v11, %v335_v10  ;;  %v341_v22 = vadd.f32 %v340_v19, %v274_v21 }
 0x35f   :  { %419 = vrot.lane.b32.xlu0 %v2551_v12, %s2325_s26  ;;  %345 = vrot.lane.b32.xlu1 %v2551_v12, %s2326_s27  ;;  %v418_v24 = vpack.c.bf16 %v341_v22, %v337_v23  ;;  %v2178_v22 = vld [vmem:[%s2900_s9 + $0x8] sm:$0xff]   ;;  %v2179_v23 = vld [vmem:[%s2900_s9] sm:$0xff]  }
 0x3d1   :  { %v346_v13 = vpop.permute.xlu1 %345  ;;  %v420_v18 = vpop.permute.xlu0 %419 }
 0x3d2   :  { %v351_v14 = vsel %vm214_vm7, %v346_v13, 0  ;;  %v422_v20 = vsel %vm214_vm7, %v420_v18, 0 }
 0x3d3   :  { %2027 = vmatpush3.bf16.xpose.msra.mxu1 %v351_v14 }
 0x3d4   :  { %2032 = vmatprep.subr.bf16.mxu1 %v2323_v15 }
 0x3da   :  { %2029 = vmatmul.mubr.msk.bf16.vlgmr.msra.gmra.mxu1 %vm214_vm7, %v2551_v12 }
 0x3db   :  { %2033 = vmatpush3.bf16.xpose.msra.mxu1 %v422_v20  ;;  %2034 = vmatprep.mubr.msk.bf16.mxu1 %vm2324_vm8, %v2323_v15 }
 0x3dc   :  { %2038 = vmatprep.subr.bf16.mxu1 %v2323_v15 }
 0x3e2   :  { %2035 = vmatmul.mubr.msk.bf16.vlgmr.msra.gmra.mxu1 %vm214_vm7, %v2551_v12 }
 0x3e3   :  { %2039 = vmatpush3.bf16.msra.mxu1 %v418_v24  ;;  %2040 = vmatprep.mubr.msk.bf16.mxu1 %vm2324_vm8, %v2323_v15 }
 0x3e4   :  { %2050 = vmatprep.subr.bf16.mxu1 %v2323_v15 }
 0x49a   :  { %v387_v26 = vpop.f32.mrf.mxu1 }
 0x49b   :  { %v388_v27 = vadd.f32 %v387_v26, %v2576_v25 }
 0x49c   :  { %v2030_v28 = vpop.f32.mrf.mxu1 }
 0x49d   :  { %v395_v30 = vsel %vm394_vm9, %v388_v27, -inf }
 0x49e   :  { %396 = vmax.xlane.f32.xlu1 %v395_v30  ;;  %v390_v31 = vpop.f32.mrf.mxu1 }
 0x49f   :  { %v391_v32 = vadd.f32 %v390_v31, %v2582_v29 }
 0x4a0   :  { %v2031_v33 = vpop.f32.mrf.mxu1 }
 0x4a1   :  { %v398_v34 = vsel %vm394_vm9, %v391_v32, -inf }
 0x4a2   :  { %399 = vmax.xlane.f32.xlu0 %v398_v34  ;;  %v458_v35 = vpop.f32.mrf.mxu1 }
 0x4a3   :  { %v459_v36 = vadd.f32 %v458_v35, %v2576_v25 }
 0x4a4   :  { %v2036_v37 = vpop.f32.mrf.mxu1 }
 0x4a5   :  { %v465_v38 = vsel %vm394_vm9, %v459_v36, -inf  ;;  %v1851_v37 = vld [vmem:[%s2901_s10] ss:$0 sm:$0xff] }
 0x4a6   :  { %466 = vmax.xlane.f32.xlu1 %v465_v38  ;;  %v461_v39 = vpop.f32.mrf.mxu1 }
 0x4a7   :  { %v462_v40 = vadd.f32 %v461_v39, %v2582_v29 }
 0x4a8   :  { %v2037_v41 = vpop.f32.mrf.mxu1 }
 0x4a9   :  { %v468_v42 = vsel %vm394_vm9, %v462_v40, -inf }
 0x4aa   :  { %469 = vmax.xlane.f32.xlu0 %v468_v42 }
 0x527   :  { %v397_v43 = vpop.xlane.xlu1 %396 }
 0x528   :  { %v401_v44 = vsub.f32 %v388_v27, %v397_v43 }
 0x52a   :  { %v403_v45 = vmul.f32 1.442695, %v401_v44 }
 0x52b   :  { %v400_v46 = vpop.xlane.xlu0 %399 }
 0x52c   :  { %2214 = vpow2.f32 %v403_v45  ;;  %v402_v47 = vsub.f32 %v391_v32, %v400_v46 }
 0x52e   :  { %v405_v48 = vmul.f32 1.442695, %v402_v47 }
 0x52f   :  { %v467_v49 = vpop.xlane.xlu1 %466 }
 0x530   :  { %2216 = vpow2.f32 %v405_v48  ;;  %v471_v50 = vsub.f32 %v459_v36, %v467_v49 }
 0x532   :  { %v473_v51 = vmul.f32 1.442695, %v471_v50 }
 0x533   :  { %v470_v52 = vpop.xlane.xlu0 %469 }
 0x534   :  { %2218 = vpow2.f32 %v473_v51  ;;  %v472_v53 = vsub.f32 %v462_v40, %v470_v52 }
 0x536   :  { %v475_v54 = vmul.f32 1.442695, %v472_v53 }
 0x538   :  { %2220 = vpow2.f32 %v475_v54 }
 0x539   :  { %v2215_v55 = vpop.eup %2214 }
 0x53a   :  { %v407_v56 = vsel %vm394_vm9, %v2215_v55, 0.0 }
 0x53b   :  { %408 = vadd.xlane.f32.xlu1 %v407_v56 }
 0x53d   :  { %v2217_v57 = vpop.eup %2216 }
 0x53e   :  { %v410_v58 = vsel %vm394_vm9, %v2217_v57, 0.0 }
 0x53f   :  { %411 = vadd.xlane.f32.xlu0 %v410_v58 }
 0x541   :  { %v2219_v59 = vpop.eup %2218 }
 0x542   :  { %v477_v60 = vsel %vm394_vm9, %v2219_v59, 0.0 }
 0x543   :  { %478 = vadd.xlane.f32.xlu1 %v477_v60 }
 0x545   :  { %v2221_v61 = vpop.eup %2220 }
 0x546   :  { %v480_v62 = vsel %vm394_vm9, %v2221_v61, 0.0 }
 0x547   :  { %481 = vadd.xlane.f32.xlu0 %v480_v62 }
 0x554   :  { %532 = vrot.lane.b32.xlu1 %v2551_v12, %s2327_s7 }
 0x5c4   :  { %v409_v1 = vpop.xlane.xlu1 %408 }
 0x5c5   :  { %2222 = vrcp.f32 %v409_v1 }
 0x5c8   :  { %v412_v5 = vpop.xlane.xlu0 %411 }
 0x5c9   :  { %2224 = vrcp.f32 %v412_v5 }
 0x5cc   :  { %v479_v6 = vpop.xlane.xlu1 %478 }
 0x5cd   :  { %2226 = vrcp.f32 %v479_v6 }
 0x5d0   :  { %v533_v7 = vpop.permute.xlu1 %532  ;;  %v482_v8 = vpop.xlane.xlu0 %481 }
 0x5d1   :  { %2228 = vrcp.f32 %v482_v8  ;;  %2045 = vmatpush3.bf16.msra.mxu0 %v533_v7  ;;  %v1855_v7 = vld [vmem:[%s2902_s11] ss:$0 sm:$0xff] }
 0x5d2   :  { %2058 = vmatprep.subr.bf16.mxu0 %v2323_v15  ;;  %v2223_v9 = vpop.eup %2222 }
 0x5d3   :  { %v415_v11 = vmul.f32 %v2223_v9, %v2215_v55 }
 0x5d6   :  { %v2225_v10 = vpop.eup %2224 }
 0x5d7   :  { %v416_v13 = vmul.f32 %v2225_v10, %v2217_v57  ;;  %v2181_v57 = vld [vmem:[%s2904_s13] sm:$0xff]  }
 0x5d9   :  { %v417_v14 = vpack.c.bf16 %v416_v13, %v415_v11  ;;  %v1856_v11 = vld [vmem:[%s2903_s12] ss:$0 sm:$0xff] }
 0x5da   :  { %v2227_v12 = vpop.eup %2226 }
 0x5db   :  { %2047 = vmatmul.mubr.msk.bf16.vlgmr.msra.gmra.mxu0 %vm394_vm9, %v417_v14  ;;  %v485_v19 = vmul.f32 %v2227_v12, %v2219_v59 }
 0x5dc   :  { %2062 = vmatprep.mubr.msk.bf16.mxu0 %vm2324_vm8, %v2323_v15 }
 0x5de   :  { %v2229_v18 = vpop.eup %2228 }
 0x5df   :  { %v486_v20 = vmul.f32 %v2229_v18, %v2221_v61 }
 0x5e1   :  { %v487_v21 = vpack.c.bf16 %v486_v20, %v485_v19  ;;  %v2182_v19 = vld [vmem:[%s2906_s15 + $0x38] sm:$0xff]   ;;  %v2183_v20 = vld [vmem:[%s2906_s15 + $0x30] sm:$0xff]  }
 0x5e3   :  { %2041 = vmatmul.mubr.msk.bf16.vlgmr.msra.gmra.mxu1 %vm394_vm9, %v487_v21  ;;  %v2184_v21 = vld [vmem:[%s2906_s15 + $0x28] sm:$0xff]  }
 0x5e4   :  { %2054 = vmatprep.mubr.msk.bf16.mxu1 %vm2324_vm8, %v2323_v15  ;;  %2051 = vmatpush3.bf16.msra.mxu1 %v2178_v22  ;;  %v2186_v22 = vld [vmem:[%s2906_s15 + $0x18] sm:$0xff]  }
 0x5e5   :  { %2052 = vmatprep.subr.bf16.mxu1 %v2323_v15 }
 0x5e8   :  { %2053 = vmatpush3.bf16.msra.mxu1 %v2179_v23  ;;  %v2187_v23 = vld [vmem:[%s2906_s15 + $0x10] sm:$0xff]  }
 0x5e9   :  { %2066 = vmatprep.subr.bf16.mxu1 %v2323_v15 }
 0x69b   :  { %v572_v24 = vpop.f32.mrf.mxu0 }
 0x69d   :  { %v2048_v26 = vpop.f32.mrf.mxu0 }
 0x69e   :  { %v2189_v26 = vld [vmem:[%s2906_s15] sm:$0xff]  }
 0x69f   :  { %v575_v27 = vpop.f32.mrf.mxu0 }
 0x6a1   :  { %v2049_v28 = vpop.f32.mrf.mxu0 }
 0x6a3   :  { %v525_v30 = vpop.f32.mrf.mxu1 }
 0x6a4   :  { %v573_v33 = vadd.f32 %v572_v24, %v525_v30  ;;  %v2188_v24 = vld [vmem:[%s2906_s15 + $0x8] sm:$0xff]  }
 0x6a5   :  { %v2042_v31 = vpop.f32.mrf.mxu1 }
 0x6a7   :  { %v528_v32 = vpop.f32.mrf.mxu1 }
 0x6a8   :  { %v576_v34 = vadd.f32 %v575_v27, %v528_v32  ;;  %v1857_v27 = vld [vmem:[%s2905_s14] ss:$0 sm:$0xff] }
 0x6a9   :  { %v2043_v35 = vpop.f32.mrf.mxu1 }
 0x6aa   :  { %v579_v36 = vpack.c.bf16 %v576_v34, %v573_v33 }
 0x6ac   :  { %2055 = vmatmul.mubr.msk.bf16.vlgmr.msra.gmra.mxu1 %vm214_vm7, %v579_v36 }
 0x6ad   :  { %2082 = vmatprep.mubr.msk.bf16.mxu1 %vm2324_vm8, %v2323_v15  ;;  %2067 = vmatpush3.bf16.msra.mxu1 %v2182_v19  ;;  %v2195_v19 = vld [vmem:[%s2934_s1 + $0x24] ss:$8 sps:$4 sm:$0xff]  }
 0x6ae   :  { %2068 = vmatprep.subr.bf16.mxu1 %v2323_v15 }
 0x6b1   :  { %2069 = vmatpush3.bf16.msra.mxu1 %v2183_v20  ;;  %v2193_v20 = vld [vmem:[%s2934_s1 + $0x20] ss:$8 sps:$4 sm:$0xff]  }
 0x6b2   :  { %2070 = vmatprep.subr.bf16.mxu1 %v2323_v15 }
 0x6b5   :  { %2071 = vmatpush3.bf16.msra.mxu1 %v2184_v21 }
 0x6b6   :  { %2072 = vmatprep.subr.bf16.mxu1 %v2323_v15 }
 0x76c   :  { %v640_v38 = vpop.f32.mrf.mxu1 }
 0x76d   :  { %v641_v39 = vadd.f32 %v1851_v37, %v640_v38 }
 0x76e   :  { %v2056_v40 = vpop.f32.mrf.mxu1 }
 0x76f   :  { %v647_v41 = vadd.f32 %v641_v39, %v2531_v63 }
 0x770   :  { %v643_v42 = vpop.f32.mrf.mxu1 }
 0x771   :  { %v644_v43 = vadd.f32 %v1851_v37, %v643_v42  ;;  %v651_v44 = vsel %vm214_vm7, %v647_v41, 0.0 }
 0x772   :  { %652 = vadd.xlane.f32.xlu0 %v651_v44  ;;  %v2057_v45 = vpop.f32.mrf.mxu1 }
 0x773   :  { %v648_v46 = vadd.f32 %v644_v43, %v2533_v0  ;;  %v2180_v0 = vld [vmem:[%s2904_s13 + $0x8] sm:$0xff]  }
 0x774   :  { %2059 = vmatpush3.bf16.msra.mxu0 %v2180_v0 }
 0x775   :  { %v654_v47 = vsel %vm214_vm7, %v648_v46, 0.0  ;;  %2060 = vmatprep.subr.bf16.mxu0 %v2323_v15 }
 0x776   :  { %655 = vadd.xlane.f32.xlu0 %v654_v47 }
 0x778   :  { %2061 = vmatpush3.bf16.msra.mxu0 %v2181_v57 }
 0x7fb   :  { %v653_v48 = vpop.xlane.xlu0 %652 }
 0x7fc   :  { %v657_v49 = vmul.f32 0.03125, %v653_v48 }
 0x7fe   :  { %v659_v50 = vsub.f32 %v647_v41, %v657_v49 }
 0x7ff   :  { %v656_v51 = vpop.xlane.xlu0 %655 }
 0x800   :  { %v658_v52 = vmul.f32 0.03125, %v656_v51  ;;  %v661_v53 = vmul.f32 %v659_v50, %v659_v50 }
 0x802   :  { %v660_v54 = vsub.f32 %v648_v46, %v658_v52  ;;  %v663_v63 = vsel %vm214_vm7, %v661_v53, 0.0 }
 0x803   :  { %664 = vadd.xlane.f32.xlu0 %v663_v63 }
 0x804   :  { %v662_v55 = vmul.f32 %v660_v54, %v660_v54 }
 0x806   :  { %v666_v56 = vsel %vm214_vm7, %v662_v55, 0.0 }
 0x807   :  { %667 = vadd.xlane.f32.xlu0 %v666_v56 }
 0x88c   :  { %v665_v58 = vpop.xlane.xlu0 %664 }
 0x88d   :  { %v669_v59 = vmul.f32 0.03125, %v665_v58 }
 0x88f   :  { %v671_v60 = vadd.f32 1e-05, %v669_v59 }
 0x890   :  { %v668_v61 = vpop.xlane.xlu0 %667 }
 0x891   :  { %2230 = vrsqrt.f32 %v671_v60  ;;  %v670_v62 = vmul.f32 0.03125, %v668_v61 }
 0x893   :  { %v672_v1 = vadd.f32 1e-05, %v670_v62 }
 0x895   :  { %2232 = vrsqrt.f32 %v672_v1 }
 0x89e   :  { %v2231_v5 = vpop.eup %2230 }
 0x89f   :  { %v675_v6 = vmul.f32 %v2231_v5, %v659_v50 }
 0x8a1   :  { %v683_v10 = vmul.f32 %v1855_v7, %v675_v6 }
 0x8a2   :  { %v2233_v8 = vpop.eup %2232 }
 0x8a3   :  { %v676_v9 = vmul.f32 %v2233_v8, %v660_v54  ;;  %v2637_v14 = vadd.f32 %v1856_v11, %v683_v10  ;;  %v1861_v54 = vld [vmem:[%s2907_s16] ss:$0 sm:$0xff] }
 0x8a5   :  { %v684_v13 = vmul.f32 %v1855_v7, %v676_v9 }
 0x8a7   :  { %v2639_v12 = vadd.f32 %v1856_v11, %v684_v13 }
 0x8a9   :  { %v693_v18 = vpack.c.bf16 %v2639_v12, %v2637_v14 }
 0x8ab   :  { %2063 = vmatmul.mubr.msk.bf16.vlgmr.msra.gmra.mxu0 %vm214_vm7, %v693_v18  ;;  %v2190_v18 = vld [vmem:[%s2934_s1 + $0x30] ss:$8 sps:$4 sm:$0xff]  }
 0x8ac   :  { %1012 = vmatprep.mubr.bf16.mxu0 %v2322_v3  ;;  %v2185_v3 = vld [vmem:[%s2906_s15 + $0x20] sm:$0xff]  }
 0x8ad   :  { %2073 = vmatpush3.bf16.msra.mxu1 %v2185_v3 }
 0x8ae   :  { %2074 = vmatprep.subr.bf16.mxu1 %v2323_v15 }
 0x8b1   :  { %2075 = vmatpush3.bf16.msra.mxu1 %v2186_v22 }
 0x8b2   :  { %2076 = vmatprep.subr.bf16.mxu1 %v2323_v15 }
 0x8b5   :  { %2077 = vmatpush3.bf16.msra.mxu1 %v2187_v23 }
 0x8b6   :  { %2078 = vmatprep.subr.bf16.mxu1 %v2323_v15 }
 0x8b9   :  { %2079 = vmatpush3.bf16.msra.mxu1 %v2188_v24 }
 0x8ba   :  { %2080 = vmatprep.subr.bf16.mxu1 %v2323_v15 }
 0x8bd   :  { %2081 = vmatpush3.bf16.msra.mxu1 %v2189_v26 }
 0x8be   :  { %2104 = vmatprep.subr.bf16.mxu1 %v2323_v15 }
 0x96b   :  { %v754_v28 = vpop.f32.mrf.mxu0 }
 0x96c   :  { %v755_v30 = vadd.f32 %v1857_v27, %v754_v28 }
 0x96d   :  { %v2064_v31 = vpop.f32.mrf.mxu0 }
 0x96e   :  { %v763_v32 = vmul.f32 0.044715, %v755_v30  ;;  %v761_v48 = vmul.f32 0.5, %v755_v30 }
 0x96f   :  { %v757_v33 = vpop.f32.mrf.mxu0 }
 0x970   :  { %v765_v34 = vmul.f32 %v763_v32, %v755_v30  ;;  %v758_v35 = vadd.f32 %v1857_v27, %v757_v33 }
 0x971   :  { %v2065_v36 = vpop.f32.mrf.mxu0 }
 0x972   :  { %v767_v37 = vmul.f32 %v765_v34, %v755_v30  ;;  %v764_v38 = vmul.f32 0.044715, %v758_v35  ;;  %v762_v49 = vmul.f32 0.5, %v758_v35  ;;  %v1871_v34 = vld [vmem:[%s2909_s18] ss:$0 sm:$0xff] }
 0x974   :  { %v769_v39 = vadd.f32 %v767_v37, %v755_v30  ;;  %v766_v40 = vmul.f32 %v764_v38, %v758_v35  ;;  %v1870_v30 = vld [vmem:[%s2908_s17] ss:$0 sm:$0xff] }
 0x976   :  { %v771_v41 = vmul.f32 0.7978846, %v769_v39  ;;  %v768_v42 = vmul.f32 %v766_v40, %v758_v35  ;;  %v1876_v39 = vld [vmem:[%s2937_s5 + $0x2] sm:$0x3] }
 0x978   :  { %2234 = vtanh.f32 %v771_v41  ;;  %v770_v43 = vadd.f32 %v768_v42, %v758_v35  ;;  %v950_v41 = vrot.slane %v1876_v39, %v269_v4 }
 0x97a   :  { %v772_v44 = vmul.f32 0.7978846, %v770_v43 }
 0x97c   :  { %2236 = vtanh.f32 %v772_v44 }
 0x985   :  { %v2235_v45 = vpop.eup %2234 }
 0x986   :  { %v775_v46 = vadd.f32 1.0, %v2235_v45 }
 0x988   :  { %v777_v51 = vmul.f32 %v775_v46, %v761_v48 }
 0x989   :  { %v2237_v47 = vpop.eup %2236 }
 0x98a   :  { %v776_v50 = vadd.f32 1.0, %v2237_v47 }
 0x98c   :  { %v778_v52 = vmul.f32 %v776_v50, %v762_v49 }
 0x98e   :  { %v779_v53 = vpack.c.bf16 %v778_v52, %v777_v51  ;;  %v954_v51 = vrot.slane %v1876_v39, %v273_v16 }
 0x990   :  { %2083 = vmatmul.mubr.bf16.vlgmr.msra.gmra.mxu1 %v779_v53 }
 0x991   :  { %2106 = vmatprep.mubr.msk.bf16.mxu1 %vm2324_vm8, %v2323_v15 }
 0xa50   :  { %v885_v63 = vpop.f32.mrf.mxu1 }
 0xa51   :  { %v886_v55 = vadd.f32 %v1861_v54, %v885_v63 }
 0xa52   :  { %v2084_v56 = vpop.f32.mrf.mxu1 }
 0xa53   :  { %v892_v0 = vadd.f32 %v886_v55, %v2637_v14 }
 0xa54   :  { %v888_v57 = vpop.f32.mrf.mxu1 }
 0xa55   :  { %v889_v58 = vadd.f32 %v1861_v54, %v888_v57  ;;  %v896_v59 = vsel %vm214_vm7, %v892_v0, 0.0 }
 0xa56   :  { %897 = vadd.xlane.f32.xlu1 %v896_v59  ;;  %v2085_v60 = vpop.f32.mrf.mxu1 }
 0xa57   :  { %v893_v61 = vadd.f32 %v889_v58, %v2639_v12  ;;  %v2192_v12 = vld [vmem:[%s2934_s1 + $0x34] ss:$8 sps:$4 sm:$0xff]  }
 0xa58   :  { %992 = vmatprep.subr.bf16.mxu0 %v2192_v12 }
 0xa59   :  { %v899_v62 = vsel %vm214_vm7, %v893_v61, 0.0  ;;  %993 = vmatpush1.bf16.msra.mxu0 %v2190_v18 }
 0xa5a   :  { %900 = vadd.xlane.f32.xlu0 %v899_v62  ;;  %994 = vmatprep.subr.bf16.mxu0 %v2195_v19 }
 0xa5d   :  { %995 = vmatpush1.bf16.msra.mxu0 %v2193_v20 }
 0xa5e   :  { %2086 = vmatprep.subr.bf16.mxu0 %v2323_v15 }
 0xadf   :  { %v898_v1 = vpop.xlane.xlu1 %897 }
 0xae0   :  { %v902_v5 = vmul.f32 0.03125, %v898_v1 }
 0xae2   :  { %v904_v6 = vsub.f32 %v892_v0, %v902_v5 }
 0xae3   :  { %v901_v7 = vpop.xlane.xlu0 %900 }
 0xae4   :  { %v903_v8 = vmul.f32 0.03125, %v901_v7  ;;  %v906_v9 = vmul.f32 %v904_v6, %v904_v6 }
 0xae6   :  { %v905_v10 = vsub.f32 %v893_v61, %v903_v8  ;;  %v908_v11 = vsel %vm214_vm7, %v906_v9, 0.0 }
 0xae7   :  { %909 = vadd.xlane.f32.xlu0 %v908_v11 }
 0xae8   :  { %v907_v13 = vmul.f32 %v905_v10, %v905_v10 }
 0xaea   :  { %v911_v14 = vsel %vm214_vm7, %v907_v13, 0.0 }
 0xaeb   :  { %912 = vadd.xlane.f32.xlu0 %v911_v14 }
 0xb70   :  { %v910_v21 = vpop.xlane.xlu0 %909 }
 0xb71   :  { %v914_v3 = vmul.f32 0.03125, %v910_v21 }
 0xb73   :  { %v916_v22 = vadd.f32 1e-05, %v914_v3 }
 0xb74   :  { %v913_v23 = vpop.xlane.xlu0 %912 }
 0xb75   :  { %2238 = vrsqrt.f32 %v916_v22  ;;  %v915_v24 = vmul.f32 0.03125, %v913_v23 }
 0xb77   :  { %v917_v26 = vadd.f32 1e-05, %v915_v24 }
 0xb79   :  { %2240 = vrsqrt.f32 %v917_v26 }
 0xb82   :  { %v2239_v27 = vpop.eup %2238 }
 0xb83   :  { %v920_v28 = vmul.f32 %v2239_v27, %v904_v6 }
 0xb85   :  { %v928_v33 = vmul.f32 %v1870_v30, %v920_v28 }
 0xb86   :  { %v2241_v31 = vpop.eup %2240 }
 0xb87   :  { %v921_v32 = vmul.f32 %v2241_v31, %v905_v10  ;;  %v2710_v36 = vadd.f32 %v1871_v34, %v928_v33 }
 0xb89   :  { %v929_v35 = vmul.f32 %v1870_v30, %v921_v32 }
 0xb8b   :  { %v2712_v37 = vadd.f32 %v1871_v34, %v929_v35 }
 0xb8d   :  { %v938_v38 = vpack.c.bf16 %v2712_v37, %v2710_v36 }
 0xb8f   :  { %1881 = vmatmul.mubr.msk.bf16.vlgmr.msra.gmra.mxu0 %vm214_vm7, %v938_v38 }
 0xb90   :  { %2088 = vmatprep.mubr.msk.bf16.mxu0 %vm2324_vm8, %v2323_v15 }
 0xc4f   :  { %v1014_v40 = vpop.f32.mrf.mxu0 }
 0xc50   :  { %v1015_v44 = vadd.f32 %v1014_v40, %v950_v41 }
 0xc51   :  { %v1016_v42 = vpop.f32.mrf.mxu0 }
 0xc52   :  { %v1017_v53 = vadd.f32 %v1016_v42, %v954_v51 }
 0xc53   :  { %v1018_v43 = vpop.f32.mrf.mxu0 }
 0xc54   :  { %v1019_v45 = vadd.f32 %v1018_v43, %v950_v41 }
 0xc55   :  { %v1020_v4 = vpop.f32.mrf.mxu0 }
 0xc56   :  { %v2724_v46 = vpack.c.bf16 %v1019_v45, %v1015_v44  ;;  %v1021_v52 = vadd.f32 %v1020_v4, %v954_v51 }
 0xc58   :  { %1025 = vrot.lane.b32.xlu0 %v2724_v46, %s2326_s27  ;;  %v1097_v54 = vpack.c.bf16 %v1021_v52, %v1017_v53 }
 0xc5c   :  { %1098 = vrot.lane.b32.xlu0 %v2724_v46, %s2325_s26 }
 0xcca   :  { %v1026_v47 = vpop.permute.xlu0 %1025 }
 0xccb   :  { %v1031_v48 = vsel %vm214_vm7, %v1026_v47, 0  ;;  %v2196_v47 = vld [vmem:[%s2900_s9 + $0x18] sm:$0xff]  }
 0xccc   :  { %2087 = vmatpush3.bf16.xpose.msra.mxu0 %v1031_v48  ;;  %v2197_v48 = vld [vmem:[%s2900_s9 + $0x10] sm:$0xff]  }
 0xccd   :  { %2092 = vmatprep.subr.bf16.mxu0 %v2323_v15 }
 0xcce   :  { %v1099_v49 = vpop.permute.xlu0 %1098 }
 0xccf   :  { %v1101_v50 = vsel %vm214_vm7, %v1099_v49, 0 }
 0xcd3   :  { %2089 = vmatmul.mubr.msk.bf16.vlgmr.msra.gmra.mxu0 %vm214_vm7, %v2724_v46 }
 0xcd4   :  { %2093 = vmatpush3.bf16.xpose.msra.mxu0 %v1101_v50  ;;  %2094 = vmatprep.mubr.msk.bf16.mxu0 %vm2324_vm8, %v2323_v15 }
 0xcd5   :  { %2098 = vmatprep.subr.bf16.mxu0 %v2323_v15 }
 0xcdb   :  { %2095 = vmatmul.mubr.msk.bf16.vlgmr.msra.gmra.mxu0 %vm214_vm7, %v2724_v46 }
 0xcdc   :  { %2099 = vmatpush3.bf16.msra.mxu0 %v1097_v54  ;;  %2100 = vmatprep.mubr.msk.bf16.mxu0 %vm2324_vm8, %v2323_v15 }
 0xcdd   :  { %2110 = vmatprep.subr.bf16.mxu0 %v2323_v15 }
 0xd93   :  { %v1067_v2 = vpop.f32.mrf.mxu0 }
 0xd94   :  { %v1068_v16 = vadd.f32 %v1067_v2, %v2576_v25 }
 0xd95   :  { %v2090_v63 = vpop.f32.mrf.mxu0 }
 0xd96   :  { %v1074_v55 = vsel %vm394_vm9, %v1068_v16, -inf }
 0xd97   :  { %1075 = vmax.xlane.f32.xlu1 %v1074_v55  ;;  %v1070_v56 = vpop.f32.mrf.mxu0 }
 0xd98   :  { %v1071_v0 = vadd.f32 %v1070_v56, %v2582_v29  ;;  %v1891_v56 = vld [vmem:[%s2901_s10 + $0x1] ss:$0 sm:$0xff] }
 0xd99   :  { %v2091_v57 = vpop.f32.mrf.mxu0 }
 0xd9a   :  { %v1077_v58 = vsel %vm394_vm9, %v1071_v0, -inf }
 0xd9b   :  { %1078 = vmax.xlane.f32.xlu0 %v1077_v58  ;;  %v1137_v59 = vpop.f32.mrf.mxu0 }
 0xd9c   :  { %v1138_v60 = vadd.f32 %v1137_v59, %v2576_v25 }
 0xd9d   :  { %v2096_v61 = vpop.f32.mrf.mxu0 }
 0xd9e   :  { %v1144_v62 = vsel %vm394_vm9, %v1138_v60, -inf }
 0xd9f   :  { %1145 = vmax.xlane.f32.xlu1 %v1144_v62  ;;  %v1140_v1 = vpop.f32.mrf.mxu0 }
 0xda0   :  { %v1141_v5 = vadd.f32 %v1140_v1, %v2582_v29 }
 0xda1   :  { %v2097_v6 = vpop.f32.mrf.mxu0 }
 0xda2   :  { %v1147_v7 = vsel %vm394_vm9, %v1141_v5, -inf }
 0xda3   :  { %1148 = vmax.xlane.f32.xlu1 %v1147_v7 }
 0xe20   :  { %v1076_v8 = vpop.xlane.xlu1 %1075 }
 0xe21   :  { %v1080_v9 = vsub.f32 %v1068_v16, %v1076_v8 }
 0xe23   :  { %v1082_v10 = vmul.f32 1.442695, %v1080_v9 }
 0xe24   :  { %v1079_v11 = vpop.xlane.xlu0 %1078 }
 0xe25   :  { %2242 = vpow2.f32 %v1082_v10  ;;  %v1081_v13 = vsub.f32 %v1071_v0, %v1079_v11 }
 0xe27   :  { %v1084_v14 = vmul.f32 1.442695, %v1081_v13 }
 0xe28   :  { %v1146_v12 = vpop.xlane.xlu1 %1145 }
 0xe29   :  { %2244 = vpow2.f32 %v1084_v14  ;;  %v1150_v25 = vsub.f32 %v1138_v60, %v1146_v12 }
 0xe2b   :  { %v1152_v18 = vmul.f32 1.442695, %v1150_v25 }
 0xe2c   :  { %v1149_v19 = vpop.xlane.xlu1 %1148 }
 0xe2d   :  { %2246 = vpow2.f32 %v1152_v18  ;;  %v1151_v20 = vsub.f32 %v1141_v5, %v1149_v19  ;;  %v2199_v18 = vld [vmem:[%s2904_s13 + $0x10] sm:$0xff]  }
 0xe2f   :  { %v1154_v21 = vmul.f32 1.442695, %v1151_v20 }
 0xe31   :  { %2248 = vpow2.f32 %v1154_v21 }
 0xe32   :  { %v2243_v29 = vpop.eup %2242 }
 0xe33   :  { %v1086_v3 = vsel %vm394_vm9, %v2243_v29, 0.0 }
 0xe34   :  { %1087 = vadd.xlane.f32.xlu1 %v1086_v3 }
 0xe36   :  { %v2245_v22 = vpop.eup %2244 }
 0xe37   :  { %v1089_v23 = vsel %vm394_vm9, %v2245_v22, 0.0 }
 0xe38   :  { %1090 = vadd.xlane.f32.xlu1 %v1089_v23 }
 0xe3a   :  { %v2247_v24 = vpop.eup %2246 }
 0xe3b   :  { %v1156_v26 = vsel %vm394_vm9, %v2247_v24, 0.0 }
 0xe3c   :  { %1157 = vadd.xlane.f32.xlu1 %v1156_v26  ;;  %v1897_v26 = vld [vmem:[%s2902_s11 + $0x1] ss:$0 sm:$0xff] }
 0xe3e   :  { %v2249_v27 = vpop.eup %2248 }
 0xe3f   :  { %v1159_v28 = vsel %vm394_vm9, %v2249_v27, 0.0 }
 0xe40   :  { %1160 = vadd.xlane.f32.xlu1 %v1159_v28 }
 0xe51   :  { %1211 = vrot.lane.b32.xlu1 %v2724_v46, %s2327_s7 }
 0xebd   :  { %v1088_v30 = vpop.xlane.xlu1 %1087 }
 0xebe   :  { %2250 = vrcp.f32 %v1088_v30 }
 0xec1   :  { %v1091_v31 = vpop.xlane.xlu1 %1090 }
 0xec2   :  { %2252 = vrcp.f32 %v1091_v31  ;;  %v1898_v31 = vld [vmem:[%s2903_s12 + $0x1] ss:$0 sm:$0xff] }
 0xec5   :  { %v1158_v32 = vpop.xlane.xlu1 %1157 }
 0xec6   :  { %2254 = vrcp.f32 %v1158_v32 }
 0xec9   :  { %v1161_v33 = vpop.xlane.xlu1 %1160 }
 0xeca   :  { %2256 = vrcp.f32 %v1161_v33 }
 0xecb   :  { %v2251_v34 = vpop.eup %2250 }
 0xecc   :  { %v1094_v39 = vmul.f32 %v2251_v34, %v2243_v29 }
 0xecd   :  { %v1212_v35 = vpop.permute.xlu1 %1211 }
 0xece   :  { %2105 = vmatpush3.bf16.msra.mxu1 %v1212_v35 }
 0xecf   :  { %v2253_v38 = vpop.eup %2252  ;;  %2118 = vmatprep.subr.bf16.mxu1 %v2323_v15 }
 0xed0   :  { %v1095_v40 = vmul.f32 %v2253_v38, %v2245_v22  ;;  %v2200_v38 = vld [vmem:[%s2906_s15 + $0x78] sm:$0xff]  }
 0xed2   :  { %v1096_v41 = vpack.c.bf16 %v1095_v40, %v1094_v39  ;;  %v2201_v39 = vld [vmem:[%s2906_s15 + $0x70] sm:$0xff]   ;;  %v2202_v40 = vld [vmem:[%s2906_s15 + $0x68] sm:$0xff]  }
 0xed3   :  { %v2255_v42 = vpop.eup %2254 }
 0xed4   :  { %2107 = vmatmul.mubr.msk.bf16.vlgmr.msra.gmra.mxu1 %vm394_vm9, %v1096_v41  ;;  %v1164_v44 = vmul.f32 %v2255_v42, %v2247_v24  ;;  %v2203_v41 = vld [vmem:[%s2906_s15 + $0x60] sm:$0xff]   ;;  %v2204_v42 = vld [vmem:[%s2906_s15 + $0x58] sm:$0xff]  }
 0xed5   :  { %2122 = vmatprep.mubr.msk.bf16.mxu1 %vm2324_vm8, %v2323_v15 }
 0xed7   :  { %v2257_v43 = vpop.eup %2256 }
 0xed8   :  { %v1165_v45 = vmul.f32 %v2257_v43, %v2249_v27  ;;  %v2205_v43 = vld [vmem:[%s2906_s15 + $0x50] sm:$0xff]  }
 0xeda   :  { %v1166_v46 = vpack.c.bf16 %v1165_v45, %v1164_v44  ;;  %v2206_v44 = vld [vmem:[%s2906_s15 + $0x48] sm:$0xff]   ;;  %v2207_v45 = vld [vmem:[%s2906_s15 + $0x40] sm:$0xff]  }
 0xedc   :  { %2101 = vmatmul.mubr.msk.bf16.vlgmr.msra.gmra.mxu0 %vm394_vm9, %v1166_v46  ;;  %v1904_v46 = vld [vmem:[%s2905_s14 + $0x1] ss:$0 sm:$0xff] }
 0xedd   :  { %2114 = vmatprep.mubr.msk.bf16.mxu0 %vm2324_vm8, %v2323_v15  ;;  %2111 = vmatpush3.bf16.msra.mxu0 %v2196_v47 }
 0xede   :  { %2112 = vmatprep.subr.bf16.mxu0 %v2323_v15 }
 0xee1   :  { %2113 = vmatpush3.bf16.msra.mxu0 %v2197_v48 }
 0xee2   :  { %2126 = vmatprep.subr.bf16.mxu0 %v2323_v15 }
 0xf94   :  { %v1251_v49 = vpop.f32.mrf.mxu1 }
 0xf96   :  { %v2108_v4 = vpop.f32.mrf.mxu1 }
 0xf98   :  { %v1254_v50 = vpop.f32.mrf.mxu1 }
 0xf9a   :  { %v2109_v51 = vpop.f32.mrf.mxu1 }
 0xf9c   :  { %v1204_v52 = vpop.f32.mrf.mxu0 }
 0xf9d   :  { %v1252_v2 = vadd.f32 %v1251_v49, %v1204_v52 }
 0xf9e   :  { %v2102_v53 = vpop.f32.mrf.mxu0 }
 0xfa0   :  { %v1207_v54 = vpop.f32.mrf.mxu0 }
 0xfa1   :  { %v1255_v16 = vadd.f32 %v1254_v50, %v1207_v54 }
 0xfa2   :  { %v2103_v63 = vpop.f32.mrf.mxu0 }
 0xfa3   :  { %v1258_v55 = vpack.c.bf16 %v1255_v16, %v1252_v2 }
 0xfa5   :  { %2115 = vmatmul.mubr.msk.bf16.vlgmr.msra.gmra.mxu0 %vm214_vm7, %v1258_v55 }
 0xfa6   :  { %2142 = vmatprep.mubr.msk.bf16.mxu0 %vm2324_vm8, %v2323_v15  ;;  %2127 = vmatpush3.bf16.msra.mxu0 %v2200_v38 }
 0xfa7   :  { %2128 = vmatprep.subr.bf16.mxu0 %v2323_v15 }
 0xfaa   :  { %2129 = vmatpush3.bf16.msra.mxu0 %v2201_v39 }
 0xfab   :  { %2130 = vmatprep.subr.bf16.mxu0 %v2323_v15 }
 0xfae   :  { %2131 = vmatpush3.bf16.msra.mxu0 %v2202_v40 }
 0xfaf   :  { %2132 = vmatprep.subr.bf16.mxu0 %v2323_v15 }
 0xfb2   :  { %2133 = vmatpush3.bf16.msra.mxu0 %v2203_v41  ;;  %v1936_v41 = vld [vmem:[%s2908_s17 + $0x1] ss:$0 sm:$0xff] }
 0xfb3   :  { %2134 = vmatprep.subr.bf16.mxu0 %v2323_v15 }
 0xfb6   :  { %2135 = vmatpush3.bf16.msra.mxu0 %v2204_v42 }
 0xfb7   :  { %2136 = vmatprep.subr.bf16.mxu0 %v2323_v15 }
 0xfba   :  { %2137 = vmatpush3.bf16.msra.mxu0 %v2205_v43  ;;  %v1937_v43 = vld [vmem:[%s2909_s18 + $0x1] ss:$0 sm:$0xff] }
 0xfbb   :  { %2138 = vmatprep.subr.bf16.mxu0 %v2323_v15 }
 0xfbe   :  { %2139 = vmatpush3.bf16.msra.mxu0 %v2206_v44 }
 0xfbf   :  { %2140 = vmatprep.subr.bf16.mxu0 %v2323_v15 }
 0xfc2   :  { %2141 = vmatpush3.bf16.msra.mxu0 %v2207_v45 }
0x1065   :  { %v1321_v0 = vpop.f32.mrf.mxu0 }
0x1066   :  { %v1322_v57 = vadd.f32 %v1891_v56, %v1321_v0 }
0x1067   :  { %v2116_v58 = vpop.f32.mrf.mxu0 }
0x1068   :  { %v1328_v59 = vadd.f32 %v1322_v57, %v2710_v36 }
0x1069   :  { %v1324_v60 = vpop.f32.mrf.mxu0 }
0x106a   :  { %v1325_v61 = vadd.f32 %v1891_v56, %v1324_v60  ;;  %v1334_v62 = vsel %vm214_vm7, %v1328_v59, 0.0 }
0x106b   :  { %1335 = vadd.xlane.f32.xlu0 %v1334_v62  ;;  %v2117_v1 = vpop.f32.mrf.mxu0 }
0x106c   :  { %v1329_v5 = vadd.f32 %v1325_v61, %v2712_v37  ;;  %v2198_v37 = vld [vmem:[%s2904_s13 + $0x18] sm:$0xff]  }
0x106d   :  { %2119 = vmatpush3.bf16.msra.mxu1 %v2198_v37 }
0x106e   :  { %v1337_v6 = vsel %vm214_vm7, %v1329_v5, 0.0  ;;  %2120 = vmatprep.subr.bf16.mxu1 %v2323_v15 }
0x106f   :  { %1338 = vadd.xlane.f32.xlu0 %v1337_v6 }
0x1071   :  { %2121 = vmatpush3.bf16.msra.mxu1 %v2199_v18 }
0x1072   :  { %2146 = vmatprep.subr.bf16.mxu1 %v2323_v15 }
0x10f4   :  { %v1336_v7 = vpop.xlane.xlu0 %1335 }
0x10f5   :  { %v1340_v8 = vmul.f32 0.03125, %v1336_v7 }
0x10f7   :  { %v1342_v9 = vsub.f32 %v1328_v59, %v1340_v8 }
0x10f8   :  { %v1339_v10 = vpop.xlane.xlu0 %1338 }
0x10f9   :  { %v1341_v11 = vmul.f32 0.03125, %v1339_v10  ;;  %v1344_v13 = vmul.f32 %v1342_v9, %v1342_v9 }
0x10fb   :  { %v1343_v14 = vsub.f32 %v1329_v5, %v1341_v11  ;;  %v1346_v36 = vsel %vm214_vm7, %v1344_v13, 0.0 }
0x10fc   :  { %1347 = vadd.xlane.f32.xlu0 %v1346_v36 }
0x10fd   :  { %v1345_v12 = vmul.f32 %v1343_v14, %v1343_v14 }
0x10ff   :  { %v1349_v25 = vsel %vm214_vm7, %v1345_v12, 0.0 }
0x1100   :  { %1350 = vadd.xlane.f32.xlu1 %v1349_v25 }
0x1185   :  { %v1348_v19 = vpop.xlane.xlu0 %1347 }
0x1186   :  { %v1352_v20 = vmul.f32 0.03125, %v1348_v19 }
0x1188   :  { %v1354_v21 = vadd.f32 1e-05, %v1352_v20 }
0x1189   :  { %v1351_v29 = vpop.xlane.xlu1 %1350 }
0x118a   :  { %2258 = vrsqrt.f32 %v1354_v21  ;;  %v1353_v3 = vmul.f32 0.03125, %v1351_v29 }
0x118c   :  { %v1355_v22 = vadd.f32 1e-05, %v1353_v3 }
0x118e   :  { %2260 = vrsqrt.f32 %v1355_v22 }
0x1197   :  { %v2259_v23 = vpop.eup %2258 }
0x1198   :  { %v1358_v24 = vmul.f32 %v2259_v23, %v1342_v9  ;;  %v1925_v9 = vld [vmem:[%s2907_s16 + $0x1] ss:$0 sm:$0xff] }
0x119a   :  { %v1366_v30 = vmul.f32 %v1897_v26, %v1358_v24 }
0x119b   :  { %v2261_v27 = vpop.eup %2260 }
0x119c   :  { %v1359_v28 = vmul.f32 %v2261_v27, %v1343_v14  ;;  %v2800_v33 = vadd.f32 %v1898_v31, %v1366_v30  ;;  %v2208_v30 = vld [vmem:[%s2910_s19 + $0x8] sm:$0xff]  }
0x119e   :  { %v1367_v32 = vmul.f32 %v1897_v26, %v1359_v28  ;;  %v1769_v28 = vld [vmem:[%s2939_s8] sm:$0x3] }
0x11a0   :  { %v2802_v34 = vadd.f32 %v1898_v31, %v1367_v32  ;;  %v2209_v31 = vld [vmem:[%s2910_s19] sm:$0xff]  }
0x11a2   :  { %v1376_v35 = vpack.c.bf16 %v2802_v34, %v2800_v33 }
0x11a4   :  { %2123 = vmatmul.mubr.msk.bf16.vlgmr.msra.gmra.mxu1 %vm214_vm7, %v1376_v35 }
0x11a5   :  { %2150 = vmatprep.mubr.msk.bf16.mxu1 %vm2324_vm8, %v2323_v15  ;;  %2147 = vmatpush3.bf16.msra.mxu1 %v2208_v30 }
0x11a6   :  { %2148 = vmatprep.subr.bf16.mxu1 %v2323_v15 }
0x11a9   :  { %2149 = vmatpush3.bf16.msra.mxu1 %v2209_v31 }
0x11aa   :  { %2154 = vmatprep.subr.bf16.mxu1 %v2323_v15 }
0x1264   :  { %v1439_v47 = vpop.f32.mrf.mxu1 }
0x1265   :  { %v1440_v48 = vadd.f32 %v1904_v46, %v1439_v47 }
0x1266   :  { %v2124_v49 = vpop.f32.mrf.mxu1 }
0x1267   :  { %v1448_v4 = vmul.f32 0.044715, %v1440_v48  ;;  %v1446_v61 = vmul.f32 0.5, %v1440_v48 }
0x1268   :  { %v1442_v50 = vpop.f32.mrf.mxu1 }
0x1269   :  { %v1450_v51 = vmul.f32 %v1448_v4, %v1440_v48  ;;  %v1443_v52 = vadd.f32 %v1904_v46, %v1442_v50 }
0x126a   :  { %v2125_v53 = vpop.f32.mrf.mxu1 }
0x126b   :  { %v1452_v54 = vmul.f32 %v1450_v51, %v1440_v48  ;;  %v1449_v2 = vmul.f32 0.044715, %v1443_v52  ;;  %v1447_v62 = vmul.f32 0.5, %v1443_v52 }
0x126d   :  { %v1454_v16 = vadd.f32 %v1452_v54, %v1440_v48  ;;  %v1451_v63 = vmul.f32 %v1449_v2, %v1443_v52 }
0x126f   :  { %v1456_v55 = vmul.f32 0.7978846, %v1454_v16  ;;  %v1453_v56 = vmul.f32 %v1451_v63, %v1443_v52  ;;  %v1705_v16 = vld [vmem:[%s2912_s21] sm:$0xf] }
0x1270   :  { %v1719_v63 = vsel %vm1717_vm11, %v1705_v16, 0 }
0x1271   :  { %2262 = vtanh.f32 %v1456_v55  ;;  %v1455_v0 = vadd.f32 %v1453_v56, %v1443_v52  ;;  %v1938_v55 = vld [vmem:[%s2911_s20] ss:$0 sm:$0xff]  ;;  %s2328_s20 = smov [#allocation2]  }
0x1272   :  { %s1810_s21 = sshll.u32 %s2328_s20, 4  ;;  %s1811_s21 = int_to_ptr.vmem [resolvable:$true] %s1810_s21 }
0x1273   :  { %v1457_v57 = vmul.f32 0.7978846, %v1455_v0  ;;  %p2283_p1 = scmp.lt.s32.totalorder %s1811_s21, %s1811_s21 }
0x1275   :  { %2264 = vtanh.f32 %v1457_v57 }
0x127e   :  { %v2263_v58 = vpop.eup %2262 }
0x127f   :  { %v1460_v59 = vadd.f32 1.0, %v2263_v58 }
0x1281   :  { %v1462_v5 = vmul.f32 %v1460_v59, %v1446_v61 }
0x1282   :  { %v2265_v60 = vpop.eup %2264 }
0x1283   :  { %v1461_v1 = vadd.f32 1.0, %v2265_v60 }
0x1285   :  { %v1463_v6 = vmul.f32 %v1461_v1, %v1447_v62  ;;  %v1942_v62 = vld [vmem:[%s2913_s22] ss:$0 sm:$0xff]  ;;  %s2278_s22 = scalar_lea.vmem %s1811_s21, 32 }
0x1286   :  { %p2279_p0 = scmp.ne.s32.totalorder %s1811_s21, %s2278_s22  ;;  %p2284_p2 = scmp.lt.s32.totalorder %s2278_s22, %s2278_s22 }
0x1287   :  { %v1464_v7 = vpack.c.bf16 %v1463_v6, %v1462_v5 }
0x1288   :  { %p2285_p3 = por %p2284_p2, %p2283_p1 }
0x1289   :  { %2143 = vmatmul.mubr.bf16.vlgmr.msra.gmra.mxu0 %v1464_v7 }
0x128a   :  { %p2286_p4 = pnand %p2285_p3, %p2279_p0 }
0x1349   :  { %v1572_v8 = vpop.f32.mrf.mxu0 }
0x134a   :  { %v1573_v13 = vadd.f32 %v1925_v9, %v1572_v8 }
0x134b   :  { %v2144_v10 = vpop.f32.mrf.mxu0 }
0x134c   :  { %v1579_v37 = vadd.f32 %v1573_v13, %v2800_v33 }
0x134d   :  { %v1575_v11 = vpop.f32.mrf.mxu0 }
0x134e   :  { %v1576_v14 = vadd.f32 %v1925_v9, %v1575_v11  ;;  %v1585_v18 = vsel %vm214_vm7, %v1579_v37, 0.0 }
0x134f   :  { %v2145_v36 = vpop.f32.mrf.mxu0 }
0x1350   :  { %v1580_v12 = vadd.f32 %v1576_v14, %v2802_v34 }
0x1352   :  { %v1588_v25 = vsel %vm214_vm7, %v1580_v12, 0.0 }
0x1353   :  { %1589 = vadd.xlane.f32.xlu0 %v1588_v25 }
0x1357   :  { %1586 = vadd.xlane.f32.xlu0 %v1585_v18 }
0x13dc   :  { %v1590_v19 = vpop.xlane.xlu0 %1589 }
0x13dd   :  { %v1592_v20 = vmul.f32 0.03125, %v1590_v19 }
0x13df   :  { %v1594_v21 = vsub.f32 %v1580_v12, %v1592_v20 }
0x13e0   :  { %v1587_v29 = vpop.xlane.xlu0 %1586 }
0x13e1   :  { %v1591_v3 = vmul.f32 0.03125, %v1587_v29  ;;  %v1596_v22 = vmul.f32 %v1594_v21, %v1594_v21 }
0x13e3   :  { %v1593_v23 = vsub.f32 %v1579_v37, %v1591_v3  ;;  %v1600_v24 = vsel %vm214_vm7, %v1596_v22, 0.0 }
0x13e4   :  { %1601 = vadd.xlane.f32.xlu0 %v1600_v24 }
0x13e5   :  { %v1595_v26 = vmul.f32 %v1593_v23, %v1593_v23 }
0x13e7   :  { %v1597_v27 = vsel %vm214_vm7, %v1595_v26, 0.0 }
0x13e8   :  { %1598 = vadd.xlane.f32.xlu0 %v1597_v27 }
0x13fe   :  { %1771 = vperm.xlu0 %2170, %v1769_v28  }
0x146d   :  { %v1602_v32 = vpop.xlane.xlu0 %1601 }
0x146e   :  { %v1604_v33 = vmul.f32 0.03125, %v1602_v32 }
0x1470   :  { %v1606_v34 = vadd.f32 1e-05, %v1604_v33 }
0x1471   :  { %v1599_v35 = vpop.xlane.xlu0 %1598 }
0x1472   :  { %2266 = vrsqrt.f32 %v1606_v34  ;;  %v1603_v38 = vmul.f32 0.03125, %v1599_v35 }
0x1474   :  { %v1605_v39 = vadd.f32 1e-05, %v1603_v38 }
0x1476   :  { %2268 = vrsqrt.f32 %v1605_v39 }
0x1479   :  { %v1772_v25 = vpop.permute.xlu0 %1771 }
0x147a   :  { %vm1773_vm14 = vcmp.eq.s32.totalorder %v2496_v17, %v1772_v25 }
0x147b   :  { %v1945_v18 = vsel %vm1773_vm14, 1.0, %v2323_v15 }
0x147f   :  { %v2267_v40 = vpop.eup %2266 }
0x1480   :  { %v1610_v42 = vmul.f32 %v2267_v40, %v1594_v21  ;;  %v1780_v21 = vsub.f32 1.0, %v1945_v18 }
0x1482   :  { %v1618_v44 = vmul.f32 %v1936_v41, %v1610_v42 }
0x1483   :  { %v2269_v45 = vpop.eup %2268 }
0x1484   :  { %v1609_v46 = vmul.f32 %v2269_v45, %v1593_v23  ;;  %v1626_v47 = vadd.f32 %v1937_v43, %v1618_v44 }
0x1486   :  { %v1617_v48 = vmul.f32 %v1936_v41, %v1609_v46  ;;  %v1628_v49 = vpack.c.bf16 %v1626_v47, %v1626_v47 }
0x1488   :  { %v1625_v4 = vadd.f32 %v1937_v43, %v1617_v48  ;;  %v1643_v50 = vunpack.c.l.b16 %v1628_v49 }
0x148a   :  { %v1627_v51 = vpack.c.bf16 %v1625_v4, %v1625_v4  ;;  %v1644_v53 = vrot.slane %v1643_v50, 7 }
0x148c   :  { %v1642_v52 = vunpack.c.l.b16 %v1627_v51 }
0x148e   :  { %v1646_v54 = vsel %vm1645_vm10, %v1644_v53, %v1642_v52 }
0x148f   :  { %v1647_v2 = vpack.c.b16 %v1646_v54, %v1646_v54 }
0x1491   :  { %2151 = vmatmul.mubr.msk.bf16.vlgmr.msra.gmra.mxu1 %vm214_vm7, %v1647_v2 }
0x1492   :  { %2156 = vmatprep.mubr.msk.bf16.mxu1 %vm2324_vm8, %v2323_v15  ;;  %2155 = vmatpush3.bf16.msra.mxu1 %v1719_v63 }
0x1551   :  { %v1697_v56 = vpop.f32.mrf.mxu1 }
0x1552   :  { %v1698_v0 = vadd.f32 %v1938_v55, %v1697_v56 }
0x1553   :  { %v2152_v57 = vpop.f32.mrf.mxu1 }
0x1554   :  { %v1703_v58 = vmax.f32 %v1698_v0, 0.0 }
0x1555   :  { %v1700_v59 = vpop.f32.mrf.mxu1 }
0x1556   :  { %v1704_v60 = vpack.c.bf16 %v1703_v58, %v1703_v58 }
0x1557   :  { %v2153_v61 = vpop.f32.mrf.mxu1 }
0x1558   :  { %2157 = vmatmul.mubr.msk.bf16.vlgmr.msra.gmra.mxu1 %vm1713_vm12, %v1704_v60 }
0x1618   :  { %v1755_v1 = vpop.f32.mrf.mxu1 }
0x1619   :  { %v1756_v5 = vadd.f32 %v1942_v62, %v1755_v1 }
0x161a   :  { %v2158_v6 = vpop.f32.mrf.mxu1 }
0x161b   :  { %v1944_v7 = vmul.f32 -1.442695, %v1756_v5 }
0x161c   :  { %v1758_v8 = vpop.f32.mrf.mxu1 }
0x161d   :  { %2270 = vpow2.f32 %v1944_v7 }
0x161e   :  { %v2159_v9 = vpop.f32.mrf.mxu1 }
0x162a   :  { %v2271_v10 = vpop.eup %2270 }
0x162b   :  { %v1764_v11 = vadd.f32 1.0, %v2271_v10 }
0x162d   :  { %2272 = vrcp.f32 %v1764_v11 }
0x163a   :  { %v2273_v13 = vpop.eup %2272 }
0x163b   :  { %v1776_v14 = vadd.f32 1e-12, %v2273_v13  ;;  %v1781_v36 = vsub.f32 1.0, %v2273_v13  ;;  %1768 = vst.msk [vmem:[#allocation2] sm:$0x3] %vm1767_vm13, %v2273_v13 }
0x163d   :  { %2274 = vlog2.f32 %v1776_v14  ;;  %v1782_v12 = vadd.f32 1e-12, %v1781_v36 }
0x163f   :  { %2276 = vlog2.f32 %v1782_v12 }
0x164a   :  { %v2275_v37 = vpop.eup %2274 }
0x164b   :  { %v1778_v19 = vmul.f32 0.6931472, %v2275_v37 }
0x164c   :  { %v2277_v20 = vpop.eup %2276 }
0x164d   :  { %v1784_v29 = vmul.f32 0.6931472, %v2277_v20  ;;  %v1779_v3 = vmul.f32 %v1945_v18, %v1778_v19 }
0x164f   :  { %v1785_v22 = vmul.f32 %v1784_v29, %v1780_v21 }
0x1651   :  { %v1786_v23 = vadd.f32 %v1785_v22, %v1779_v3 }
0x1653   :  { %v1787_v24 = vsub.f32 0.0, %v1786_v23 }
0x1655   :  { %v1788_v26 = vsel %vm1767_vm13, %v1787_v24, 0.0 }
0x1656   :  { %1789 = vadd.xlane.f32.xlu1 %v1788_v26 }
0x1657   :  { %2289 = shalt.err (!%p2286_p4)
}
0x1658   :  { %1813 = dma.vmem_to_hbm [thread:$0]  %s1811_s21, 32, %s2914_s23, [#allocation3]   ;;  %vm1802_vm15 = vcmask 0  }
0x1659   :  { %s2329_s29 = smov [#allocation4]  }
0x165a   :  { %s1820_s0 = sshll.u32 %s2329_s29, 4  ;;  %s1821_s0 = int_to_ptr.vmem [resolvable:$true] %s1820_s0 }
0x165b   :  { %s2298_s25 = scalar_lea.vmem %s1821_s0, 16  ;;  %s2302_s14 = scalar_lea.vmem %s1821_s0, 32 }
0x165c   :  { %p2299_p5 = scmp.ne.s32.totalorder %s1821_s0, %s2298_s25  ;;  %p2303_p6 = scmp.lt.s32.totalorder %s1821_s0, %s1821_s0 }
0x165d   :  { %p2304_p7 = scmp.lt.s32.totalorder %s2302_s14, %s2298_s25 }
0x165f   :  { %p2305_p8 = por %p2304_p7, %p2303_p6 }
0x1661   :  { %p2306_p9 = pnand %p2305_p8, %p2299_p5 }
0x16df   :  { %v1790_v15 = vpop.xlane.xlu1 %1789 }
0x16e0   :  { %v1791_v17 = vrot.slane %v1790_v15, 4 }
0x16e2   :  { %v1792_v27 = vadd.f32 %v1791_v17, %v1790_v15 }
0x16e4   :  { %v1793_v28 = vrot.slane %v1792_v27, 2 }
0x16e6   :  { %v1794_v30 = vadd.f32 %v1793_v28, %v1792_v27 }
0x16e8   :  { %v1795_v31 = vrot.slane %v1794_v30, 1 }
0x16ea   :  { %v1796_v32 = vadd.f32 %v1795_v31, %v1794_v30 }
0x16ec   :  { %2160 = vpush %v1796_v32 }
0x171d   :  { %s2161_s30 = spop %2160 }
0x171e   :  { %s1800_s3 = smul.f32 0.071428575, %s2161_s30 }
0x1720   :  { %v1801_v33 = vstv %s1800_s3 }
0x1721   :  { %1803 = vst.msk [vmem:[#allocation4] sm:$0x1] %vm1802_vm15, %v1801_v33 }
0x1722   :  { %2309 = shalt.err (!%p2306_p9)
}
0x1723   :  { %1823 = dma.vmem_to_hbm [thread:$0]  %s1821_s0, 16, %s2915_s24, [#allocation5]  }
0x1724   :  { %2318 = dma.done.wait [#allocation3], 32  }
0x1725   :  { %2319 = vsyncadd [#allocation3], 4294967264 }
0x1726   :  { %2320 = dma.done.wait [#allocation5], 16  }
0x1727   :  { %2321 = vsyncadd [#allocation5], 4294967280 }
0x1728   :  { %1830 = vsyncpa [#allocation3], 1 }
0x1729   :  { %1831 = vsyncpa [#allocation5], 1 }

</bundles_post_ra>
